<compile_context>
chip_gen: v7x
topology: tpu7x:2x2x1
jax: 0.10.0
libtpu: 0.0.40
codegen_flags: <defaults>
</compile_context>

<pallas_src>
import jax
import jax.numpy as jnp
from jax.experimental import pallas as pl
from jax.experimental.pallas import tpu as pltpu

EPS = 1e-5  # PyTorch InstanceNorm2d default


# ------------------------------ Pallas kernels ------------------------------

def _instance_norm(y):
    # y: (C, HW) f32; normalize over the spatial (lane) axis, biased variance,
    # matching nn.InstanceNorm2d(affine=False).
    mean = jnp.mean(y, axis=-1, keepdims=True)
    var = jnp.mean((y - mean) ** 2, axis=-1, keepdims=True)
    return (y - mean) * jax.lax.rsqrt(var + EPS)


def conv_in_relu_kernel(p_ref, w_ref, o_ref):
    # conv (im2col matmul, transposed so HW is lane-dense) -> InstanceNorm -> ReLU.
    # p: (1, F, HW) bf16, w: (C_out, F) bf16, o: (1, C_out, HW) f32.
    y = jnp.dot(w_ref[...], p_ref[0], preferred_element_type=jnp.float32)
    o_ref[0] = jnp.maximum(_instance_norm(y), 0.0)


def conv_in_relu_res_kernel(p_ref, w_ref, res_ref, o_ref):
    # ResnetBlock: out = x + ReLU(InstanceNorm(conv(x)))
    y = jnp.dot(w_ref[...], p_ref[0], preferred_element_type=jnp.float32)
    o_ref[0] = res_ref[0] + jnp.maximum(_instance_norm(y), 0.0)


def conv_in_relu_style_kernel(p_ref, w_ref, hotv_ref, w1_ref, b1_ref,
                              w2_ref, b2_ref, o_ref):
    # conv3 + InstanceNorm + ReLU, then add style = MLP(hotv) broadcast over HW.
    y = jnp.dot(w_ref[...], p_ref[0], preferred_element_type=jnp.float32)
    y = jnp.maximum(_instance_norm(y), 0.0)
    # style MLP in column orientation: (C, nc) @ (nc, 1) -> (C, 1), all f32.
    h = jnp.dot(w1_ref[...], hotv_ref[0], preferred_element_type=jnp.float32) + b1_ref[...]
    h = jnp.maximum(h, 0.0)
    s = jnp.dot(w2_ref[...], h, preferred_element_type=jnp.float32) + b2_ref[...]
    o_ref[0] = y + s  # (C_out, 1) broadcast over the HW lanes


def conv_bias_tanh_kernel(p_ref, w_ref, b_ref, o_ref):
    # final up_conv3: conv (with bias, no norm) -> tanh
    y = jnp.dot(w_ref[...], p_ref[0], preferred_element_type=jnp.float32)
    o_ref[0] = jnp.tanh(y + b_ref[...])


# ------------------------------ pallas_call wrappers ------------------------

_PARALLEL = pltpu.CompilerParams(dimension_semantics=("parallel",))


def _conv_fused(patches, w, residual=None):
    # patches: (B, F, HW) bf16, w: (C_out, F) bf16, residual: (B, C_out, HW) f32.
    B, F, HW = patches.shape
    C_out = w.shape[0]
    p_spec = pl.BlockSpec((1, F, HW), lambda i: (i, 0, 0))
    w_spec = pl.BlockSpec((C_out, F), lambda i: (0, 0))
    o_spec = pl.BlockSpec((1, C_out, HW), lambda i: (i, 0, 0))
    out_shape = jax.ShapeDtypeStruct((B, C_out, HW), jnp.float32)
    if residual is None:
        return pl.pallas_call(
            conv_in_relu_kernel, out_shape=out_shape, grid=(B,),
            in_specs=[p_spec, w_spec], out_specs=o_spec,
            compiler_params=_PARALLEL,
        )(patches, w)
    r_spec = pl.BlockSpec((1, C_out, HW), lambda i: (i, 0, 0))
    return pl.pallas_call(
        conv_in_relu_res_kernel, out_shape=out_shape, grid=(B,),
        in_specs=[p_spec, w_spec, r_spec], out_specs=o_spec,
        compiler_params=_PARALLEL,
    )(patches, w, residual)


def _conv_fused_style(patches, w, hotv_col, w1t, b1, w2t, b2):
    B, F, HW = patches.shape
    C_out = w.shape[0]
    nc = w1t.shape[1]
    return pl.pallas_call(
        conv_in_relu_style_kernel,
        out_shape=jax.ShapeDtypeStruct((B, C_out, HW), jnp.float32),
        grid=(B,),
        in_specs=[
            pl.BlockSpec((1, F, HW), lambda i: (i, 0, 0)),
            pl.BlockSpec((C_out, F), lambda i: (0, 0)),
            pl.BlockSpec((1, nc, 1), lambda i: (i, 0, 0)),
            pl.BlockSpec((C_out, nc), lambda i: (0, 0)),
            pl.BlockSpec((C_out, 1), lambda i: (0, 0)),
            pl.BlockSpec((C_out, C_out), lambda i: (0, 0)),
            pl.BlockSpec((C_out, 1), lambda i: (0, 0)),
        ],
        out_specs=pl.BlockSpec((1, C_out, HW), lambda i: (i, 0, 0)),
        compiler_params=_PARALLEL,
    )(patches, w, hotv_col, w1t, b1, w2t, b2)


def _conv_bias_tanh(patches, w, b):
    B, F, HW = patches.shape
    C_out = w.shape[0]
    return pl.pallas_call(
        conv_bias_tanh_kernel,
        out_shape=jax.ShapeDtypeStruct((B, C_out, HW), jnp.float32),
        grid=(B,),
        in_specs=[
            pl.BlockSpec((1, F, HW), lambda i: (i, 0, 0)),
            pl.BlockSpec((C_out, F), lambda i: (0, 0)),
            pl.BlockSpec((C_out, 1), lambda i: (0, 0)),
        ],
        out_specs=pl.BlockSpec((1, C_out, HW), lambda i: (i, 0, 0)),
        compiler_params=_PARALLEL,
    )(patches, w, b)


# ------------------------------ JAX glue -------------------------------------

def im2col_nchw(x, k, stride, pad):
    """x: (B, C, H, W) -> patches (B, k*k*C, Ho*Wo) with HW as the last axis."""
    B, C, H, W = x.shape
    xp = jnp.pad(x, ((0, 0), (0, 0), (pad, pad), (pad, pad)))
    Ho = (H + 2 * pad - k) // stride + 1
    Wo = (W + 2 * pad - k) // stride + 1
    cols = []
    for kh in range(k):
        for kw in range(k):
            cols.append(xp[:, :, kh:kh + stride * Ho:stride, kw:kw + stride * Wo:stride])
    p = jnp.stack(cols, axis=1)                      # (B, k*k, C, Ho, Wo)
    return p.reshape(B, k * k * C, Ho * Wo), Ho, Wo


def upsample_im2col_nchw(x, k=3):
    """Nearest-2x upsample folded into im2col (pad=1, stride=1).

    Produces the same patches as im2col(nearest_upsample_2x(x), k, 1, 1) without
    ever materializing the 4x-larger upsampled tensor.
    x: (B, C, H, W) -> patches (B, k*k*C, (2H)*(2W)).
    """
    B, C, H, W = x.shape
    Hu, Wu = 2 * H, 2 * W
    xp = jnp.pad(x, ((0, 0), (0, 0), (1, 1), (1, 1)))   # original, zero-padded by 1

    def src_idx(r, n):
        # padded-upsampled coordinate r in [0, 2n+1] -> padded-original index.
        return jnp.clip((r - 1) // 2 + 1, 0, n + 1)

    row_map = src_idx(jnp.arange(Hu + 2), H)
    col_map = src_idx(jnp.arange(Wu + 2), W)
    cols = []
    for kh in range(k):
        for kw in range(k):
            ri = row_map[kh:kh + Hu]
            ci = col_map[kw:kw + Wu]
            cols.append(xp[:, :, ri, :][:, :, :, ci])
    p = jnp.stack(cols, axis=1)                      # (B, k*k, C, Hu, Wu)
    return p.reshape(B, k * k * C, Hu * Wu), Hu, Wu


def _bf16(a):
    return a.astype(jnp.bfloat16)


def down_block(x, w):
    """conv(k=4, s=2, p=1) + InstanceNorm + ReLU (NCHW in/out)."""
    B = x.shape[0]
    p, Ho, Wo = im2col_nchw(x, 4, 2, 1)
    y = _conv_fused(_bf16(p), _bf16(w))
    return y.reshape(B, w.shape[0], Ho, Wo)


def down_block_style(x, w, hotv, w1t, b1, w2t, b2):
    """conv3 + InstanceNorm + ReLU, with the style MLP + add fused in-kernel."""
    B = x.shape[0]
    p, Ho, Wo = im2col_nchw(x, 4, 2, 1)
    hotv_col = hotv.astype(jnp.float32)[:, :, None]   # (B, num_classes, 1)
    y = _conv_fused_style(_bf16(p), _bf16(w), hotv_col, w1t, b1, w2t, b2)
    return y.reshape(B, w.shape[0], Ho, Wo)


def resnet_block(x, w):
    """x + ReLU(InstanceNorm(conv(k=3, s=1, p=1)(x)))."""
    B, C, H, W = x.shape
    p, _, _ = im2col_nchw(x, 3, 1, 1)
    res = x.reshape(B, C, H * W)                      # f32 residual
    y = _conv_fused(_bf16(p), _bf16(w), residual=res)
    return y.reshape(B, C, H, W)


def up_block(x, w):
    """Upsample nearest 2x (folded) + conv(k=3, s=1, p=1) + InstanceNorm + ReLU."""
    B = x.shape[0]
    p, Ho, Wo = upsample_im2col_nchw(x)
    y = _conv_fused(_bf16(p), _bf16(w))
    return y.reshape(B, w.shape[0], Ho, Wo)


def up_block_tanh(x, w, b):
    """Upsample nearest 2x (folded) + conv(k=3, s=1, p=1, bias) + Tanh."""
    B = x.shape[0]
    p, Ho, Wo = upsample_im2col_nchw(x)
    y = _conv_bias_tanh(_bf16(p), _bf16(w), b)
    return y.reshape(B, w.shape[0], Ho, Wo)


def generator_forward(params, x_nchw, hotv):
    x = x_nchw.astype(jnp.float32)                    # already NCHW, keep it

    x = down_block(x, params["conv1_w"])
    x = down_block(x, params["conv2_w"])
    x = down_block_style(x, params["conv3_w"], hotv,
                         params["mlp_w1t"], params["mlp_b1"],
                         params["mlp_w2t"], params["mlp_b2"])

    x = resnet_block(x, params["res1_w"])
    x = resnet_block(x, params["res2_w"])
    x = resnet_block(x, params["res3_w"])

    x = up_block(x, params["up1_w"])
    x = up_block(x, params["up2_w"])
    x = up_block_tanh(x, params["up3_w"], params["up3_b"])

    # matches PyTorch `x.squeeze()` (no-op for B >= 2, all dims > 1)
    return jnp.squeeze(x)


# ------------------------------ parameter init --------------------------------

def init_params(key, conv_dim, num_classes):
    def w(key_, fan_in, shape):
        return jax.random.normal(key_, shape, jnp.float32) / jnp.sqrt(float(fan_in))

    keys = jax.random.split(key, 12)
    cd = conv_dim
    params = {
        # conv weights stored as (C_out, k*k*C_in) to match the transposed matmul
        "conv1_w": w(keys[0], 4 * 4 * 3,      (cd,      4 * 4 * 3)),
        "conv2_w": w(keys[1], 4 * 4 * cd,     (2 * cd,  4 * 4 * cd)),
        "conv3_w": w(keys[2], 4 * 4 * 2 * cd, (4 * cd,  4 * 4 * 2 * cd)),
        # style MLP stored transposed (column orientation) for in-kernel fusion
        "mlp_w1t": w(keys[3], num_classes,    (4 * cd,  num_classes)),
        "mlp_b1":  jnp.zeros((4 * cd, 1), jnp.float32),
        "mlp_w2t": w(keys[4], 4 * cd,         (4 * cd,  4 * cd)),
        "mlp_b2":  jnp.zeros((4 * cd, 1), jnp.float32),
        "res1_w":  w(keys[5], 3 * 3 * 4 * cd, (4 * cd,  3 * 3 * 4 * cd)),
        "res2_w":  w(keys[6], 3 * 3 * 4 * cd, (4 * cd,  3 * 3 * 4 * cd)),
        "res3_w":  w(keys[7], 3 * 3 * 4 * cd, (4 * cd,  3 * 3 * 4 * cd)),
        "up1_w":   w(keys[8], 3 * 3 * 4 * cd, (2 * cd,  3 * 3 * 4 * cd)),
        "up2_w":   w(keys[9], 3 * 3 * 2 * cd, (cd,      3 * 3 * 2 * cd)),
        "up3_w":   w(keys[10], 3 * 3 * cd,    (3,       3 * 3 * cd)),
        "up3_b":   jnp.zeros((3, 1), jnp.float32),
    }
    return params


# ------------------------------ main ------------------------------------------

if __name__ == "__main__":
    B, H, W = 2, 16, 16
    conv_dim = 8
    num_classes = 7

    key = jax.random.PRNGKey(0)
    k_params, k_x, k_cls = jax.random.split(key, 3)

    params = init_params(k_params, conv_dim, num_classes)
    x = jax.random.normal(k_x, (B, 3, H, W), jnp.float32)          # NCHW like PyTorch
    labels = jax.random.randint(k_cls, (B,), 0, num_classes)
    hotv = jax.nn.one_hot(labels, num_classes, dtype=jnp.float32)  # (B, num_classes)

    out = jax.jit(generator_forward)(params, x, hotv)
    out = jax.block_until_ready(out)

    assert out.shape == (B, 3, H, W), out.shape
    assert bool(jnp.all(jnp.isfinite(out)))
    assert bool(jnp.all(jnp.abs(out) <= 1.0))                      # tanh output range
    print("KERNEL_OK")
</pallas_src>

<mosaic_0001>
module attributes {stable_mosaic.version = 11 : i64} {
  func.func @conv_in_relu_kernel(%arg0: i32, %arg1: memref<1x48x64xbf16, #tpu.memory_space<vmem>>, %arg2: memref<8x48xbf16, #tpu.memory_space<vmem>>, %arg3: memref<1x8x64xf32, #tpu.memory_space<vmem>>) attributes {dimension_semantics = [#tpu.dimension_semantics<parallel>], iteration_bounds = array<i64: 2>, scalar_prefetch = 0 : i64, scratch_operands = 0 : i64, tpu.core_type = #tpu.core_type<tc>, window_params = [{transform_indices = @transform_0, window_bounds = array<i64: 1, 48, 64>}, {pipeline_mode = #tpu.pipeline_mode<synchronous>, transform_indices = @transform_1, window_bounds = array<i64: 8, 48>}, {transform_indices = @transform_2, window_bounds = array<i64: 1, 8, 64>}]} {
    %c0 = arith.constant 0 : index
    %c0_0 = arith.constant 0 : index
    %0 = vector.load %arg2[%c0, %c0_0] : memref<8x48xbf16, #tpu.memory_space<vmem>>, vector<8x48xbf16>
    %c0_1 = arith.constant 0 : index
    %c0_2 = arith.constant 0 : index
    %c0_3 = arith.constant 0 : index
    %1 = vector.load %arg1[%c0_1, %c0_2, %c0_3] : memref<1x48x64xbf16, #tpu.memory_space<vmem>>, vector<1x48x64xbf16>
    %2 = vector.shape_cast %1 : vector<1x48x64xbf16> to vector<48x64xbf16>
    %cst = arith.constant dense<0.000000e+00> : vector<8x64xf32>
    %3 = tpu.matmul %0, %2, %cst {dimension_numbers = #tpu.dot_dimension_numbers<[1], [0], [0], [1], [0, 0, 1, 1], [], []>} : vector<8x48xbf16>, vector<48x64xbf16>, vector<8x64xf32> -> vector<8x64xf32>
    %cst_4 = arith.constant dense<0.000000e+00> : vector<8xf32>
    %4 = vector.multi_reduction <add>, %3, %cst_4 [1] : vector<8x64xf32> to vector<8xf32>
    %5 = vector.shape_cast %4 : vector<8xf32> to vector<8x1xf32>
    %cst_5 = arith.constant 6.400000e+01 : f32
    %6 = vector.broadcast %cst_5 : f32 to vector<8x1xf32>
    %7 = arith.divf %5, %6 : vector<8x1xf32>
    %8 = vector.broadcast %7 : vector<8x1xf32> to vector<8x64xf32>
    %9 = arith.subf %3, %8 : vector<8x64xf32>
    %10 = arith.mulf %9, %9 : vector<8x64xf32>
    %cst_6 = arith.constant dense<0.000000e+00> : vector<8xf32>
    %11 = vector.multi_reduction <add>, %10, %cst_6 [1] : vector<8x64xf32> to vector<8xf32>
    %12 = vector.shape_cast %11 : vector<8xf32> to vector<8x1xf32>
    %cst_7 = arith.constant 6.400000e+01 : f32
    %13 = vector.broadcast %cst_7 : f32 to vector<8x1xf32>
    %14 = arith.divf %12, %13 : vector<8x1xf32>
    %15 = vector.broadcast %7 : vector<8x1xf32> to vector<8x64xf32>
    %16 = arith.subf %3, %15 : vector<8x64xf32>
    %cst_8 = arith.constant 9.99999974E-6 : f32
    %17 = vector.broadcast %cst_8 : f32 to vector<8x1xf32>
    %18 = arith.addf %14, %17 : vector<8x1xf32>
    %19 = math.rsqrt %18 : vector<8x1xf32>
    %20 = vector.broadcast %19 : vector<8x1xf32> to vector<8x64xf32>
    %21 = arith.mulf %16, %20 : vector<8x64xf32>
    %cst_9 = arith.constant 0.000000e+00 : f32
    %22 = vector.broadcast %cst_9 : f32 to vector<8x64xf32>
    %23 = arith.maximumf %21, %22 : vector<8x64xf32>
    %c0_10 = arith.constant 0 : index
    %c0_11 = arith.constant 0 : index
    %c0_12 = arith.constant 0 : index
    %24 = vector.load %arg3[%c0_10, %c0_11, %c0_12] : memref<1x8x64xf32, #tpu.memory_space<vmem>>, vector<1x8x64xf32>
    %25 = vector.shape_cast %24 : vector<1x8x64xf32> to vector<8x64xf32>
    %26 = vector.shape_cast %23 : vector<8x64xf32> to vector<1x8x64xf32>
    tpu.vector_store %arg3[%c0_10, %c0_11, %c0_12], %26 {strides = array<i32>} : memref<1x8x64xf32, #tpu.memory_space<vmem>>, vector<1x8x64xf32>,
    return
  }
  func.func @transform_0(%arg0: i32) -> (i32, i32, i32) {
    %c0_i32 = arith.constant 0 : i32
    %c0_i32_0 = arith.constant 0 : i32
    %c0_i32_1 = arith.constant 0 : i32
    return %arg0, %c0_i32, %c0_i32_0 : i32, i32, i32
  }
  func.func @transform_1(%arg0: i32) -> (i32, i32) {
    %c0_i32 = arith.constant 0 : i32
    %c0_i32_0 = arith.constant 0 : i32
    %c0_i32_1 = arith.constant 0 : i32
    return %c0_i32, %c0_i32_0 : i32, i32
  }
  func.func @transform_2(%arg0: i32) -> (i32, i32, i32) {
    %c0_i32 = arith.constant 0 : i32
    %c0_i32_0 = arith.constant 0 : i32
    %c0_i32_1 = arith.constant 0 : i32
    return %arg0, %c0_i32, %c0_i32_0 : i32, i32, i32
  }
}

module attributes {stable_mosaic.version = 11 : i64} {
  func.func @conv_in_relu_kernel(%arg0: i32, %arg1: memref<1x128x16xbf16, #tpu.memory_space<vmem>>, %arg2: memref<16x128xbf16, #tpu.memory_space<vmem>>, %arg3: memref<1x16x16xf32, #tpu.memory_space<vmem>>) attributes {dimension_semantics = [#tpu.dimension_semantics<parallel>], iteration_bounds = array<i64: 2>, scalar_prefetch = 0 : i64, scratch_operands = 0 : i64, tpu.core_type = #tpu.core_type<tc>, window_params = [{transform_indices = @transform_0, window_bounds = array<i64: 1, 128, 16>}, {pipeline_mode = #tpu.pipeline_mode<synchronous>, transform_indices = @transform_1, window_bounds = array<i64: 16, 128>}, {transform_indices = @transform_2, window_bounds = array<i64: 1, 16, 16>}]} {
    %c0 = arith.constant 0 : index
    %c0_0 = arith.constant 0 : index
    %0 = vector.load %arg2[%c0, %c0_0] : memref<16x128xbf16, #tpu.memory_space<vmem>>, vector<16x128xbf16>
    %c0_1 = arith.constant 0 : index
    %c0_2 = arith.constant 0 : index
    %c0_3 = arith.constant 0 : index
    %1 = vector.load %arg1[%c0_1, %c0_2, %c0_3] : memref<1x128x16xbf16, #tpu.memory_space<vmem>>, vector<1x128x16xbf16>
    %2 = vector.shape_cast %1 : vector<1x128x16xbf16> to vector<128x16xbf16>
    %cst = arith.constant dense<0.000000e+00> : vector<16x16xf32>
    %3 = tpu.matmul %0, %2, %cst {dimension_numbers = #tpu.dot_dimension_numbers<[1], [0], [0], [1], [0, 0, 1, 1], [], []>} : vector<16x128xbf16>, vector<128x16xbf16>, vector<16x16xf32> -> vector<16x16xf32>
    %cst_4 = arith.constant dense<0.000000e+00> : vector<16xf32>
    %4 = vector.multi_reduction <add>, %3, %cst_4 [1] : vector<16x16xf32> to vector<16xf32>
    %5 = vector.shape_cast %4 : vector<16xf32> to vector<16x1xf32>
    %cst_5 = arith.constant 1.600000e+01 : f32
    %6 = vector.broadcast %cst_5 : f32 to vector<16x1xf32>
    %7 = arith.divf %5, %6 : vector<16x1xf32>
    %8 = vector.broadcast %7 : vector<16x1xf32> to vector<16x16xf32>
    %9 = arith.subf %3, %8 : vector<16x16xf32>
    %10 = arith.mulf %9, %9 : vector<16x16xf32>
    %cst_6 = arith.constant dense<0.000000e+00> : vector<16xf32>
    %11 = vector.multi_reduction <add>, %10, %cst_6 [1] : vector<16x16xf32> to vector<16xf32>
    %12 = vector.shape_cast %11 : vector<16xf32> to vector<16x1xf32>
    %cst_7 = arith.constant 1.600000e+01 : f32
    %13 = vector.broadcast %cst_7 : f32 to vector<16x1xf32>
    %14 = arith.divf %12, %13 : vector<16x1xf32>
    %15 = vector.broadcast %7 : vector<16x1xf32> to vector<16x16xf32>
    %16 = arith.subf %3, %15 : vector<16x16xf32>
    %cst_8 = arith.constant 9.99999974E-6 : f32
    %17 = vector.broadcast %cst_8 : f32 to vector<16x1xf32>
    %18 = arith.addf %14, %17 : vector<16x1xf32>
    %19 = math.rsqrt %18 : vector<16x1xf32>
    %20 = vector.broadcast %19 : vector<16x1xf32> to vector<16x16xf32>
    %21 = arith.mulf %16, %20 : vector<16x16xf32>
    %cst_9 = arith.constant 0.000000e+00 : f32
    %22 = vector.broadcast %cst_9 : f32 to vector<16x16xf32>
    %23 = arith.maximumf %21, %22 : vector<16x16xf32>
    %c0_10 = arith.constant 0 : index
    %c0_11 = arith.constant 0 : index
    %c0_12 = arith.constant 0 : index
    %24 = vector.load %arg3[%c0_10, %c0_11, %c0_12] : memref<1x16x16xf32, #tpu.memory_space<vmem>>, vector<1x16x16xf32>
    %25 = vector.shape_cast %24 : vector<1x16x16xf32> to vector<16x16xf32>
    %26 = vector.shape_cast %23 : vector<16x16xf32> to vector<1x16x16xf32>
    tpu.vector_store %arg3[%c0_10, %c0_11, %c0_12], %26 {strides = array<i32>} : memref<1x16x16xf32, #tpu.memory_space<vmem>>, vector<1x16x16xf32>,
    return
  }
  func.func @transform_0(%arg0: i32) -> (i32, i32, i32) {
    %c0_i32 = arith.constant 0 : i32
    %c0_i32_0 = arith.constant 0 : i32
    %c0_i32_1 = arith.constant 0 : i32
    return %arg0, %c0_i32, %c0_i32_0 : i32, i32, i32
  }
  func.func @transform_1(%arg0: i32) -> (i32, i32) {
    %c0_i32 = arith.constant 0 : i32
    %c0_i32_0 = arith.constant 0 : i32
    %c0_i32_1 = arith.constant 0 : i32
    return %c0_i32, %c0_i32_0 : i32, i32
  }
  func.func @transform_2(%arg0: i32) -> (i32, i32, i32) {
    %c0_i32 = arith.constant 0 : i32
    %c0_i32_0 = arith.constant 0 : i32
    %c0_i32_1 = arith.constant 0 : i32
    return %arg0, %c0_i32, %c0_i32_0 : i32, i32, i32
  }
}

module attributes {stable_mosaic.version = 11 : i64} {
  func.func @conv_in_relu_style_kernel(%arg0: i32, %arg1: memref<1x256x4xbf16, #tpu.memory_space<vmem>>, %arg2: memref<32x256xbf16, #tpu.memory_space<vmem>>, %arg3: memref<1x7x1xf32, #tpu.memory_space<vmem>>, %arg4: memref<32x7xf32, #tpu.memory_space<vmem>>, %arg5: memref<32x1xf32, #tpu.memory_space<vmem>>, %arg6: memref<32x32xf32, #tpu.memory_space<vmem>>, %arg7: memref<32x1xf32, #tpu.memory_space<vmem>>, %arg8: memref<1x32x4xf32, #tpu.memory_space<vmem>>) attributes {dimension_semantics = [#tpu.dimension_semantics<parallel>], iteration_bounds = array<i64: 2>, scalar_prefetch = 0 : i64, scratch_operands = 0 : i64, tpu.core_type = #tpu.core_type<tc>, window_params = [{transform_indices = @transform_0, window_bounds = array<i64: 1, 256, 4>}, {pipeline_mode = #tpu.pipeline_mode<synchronous>, transform_indices = @transform_1, window_bounds = array<i64: 32, 256>}, {transform_indices = @transform_2, window_bounds = array<i64: 1, 7, 1>}, {pipeline_mode = #tpu.pipeline_mode<synchronous>, transform_indices = @transform_3, window_bounds = array<i64: 32, 7>}, {pipeline_mode = #tpu.pipeline_mode<synchronous>, transform_indices = @transform_4, window_bounds = array<i64: 32, 1>}, {pipeline_mode = #tpu.pipeline_mode<synchronous>, transform_indices = @transform_5, window_bounds = array<i64: 32, 32>}, {pipeline_mode = #tpu.pipeline_mode<synchronous>, transform_indices = @transform_6, window_bounds = array<i64: 32, 1>}, {transform_indices = @transform_7, window_bounds = array<i64: 1, 32, 4>}]} {
    %c0 = arith.constant 0 : index
    %c0_0 = arith.constant 0 : index
    %0 = vector.load %arg2[%c0, %c0_0] : memref<32x256xbf16, #tpu.memory_space<vmem>>, vector<32x256xbf16>
    %c0_1 = arith.constant 0 : index
    %c0_2 = arith.constant 0 : index
    %c0_3 = arith.constant 0 : index
    %1 = vector.load %arg1[%c0_1, %c0_2, %c0_3] : memref<1x256x4xbf16, #tpu.memory_space<vmem>>, vector<1x256x4xbf16>
    %2 = vector.shape_cast %1 : vector<1x256x4xbf16> to vector<256x4xbf16>
    %cst = arith.constant dense<0.000000e+00> : vector<32x4xf32>
    %3 = tpu.matmul %0, %2, %cst {dimension_numbers = #tpu.dot_dimension_numbers<[1], [0], [0], [1], [0, 0, 1, 1], [], []>} : vector<32x256xbf16>, vector<256x4xbf16>, vector<32x4xf32> -> vector<32x4xf32>
    %cst_4 = arith.constant dense<0.000000e+00> : vector<32xf32>
    %4 = vector.multi_reduction <add>, %3, %cst_4 [1] : vector<32x4xf32> to vector<32xf32>
    %5 = vector.shape_cast %4 : vector<32xf32> to vector<32x1xf32>
    %cst_5 = arith.constant 4.000000e+00 : f32
    %6 = vector.broadcast %cst_5 : f32 to vector<32x1xf32>
    %7 = arith.divf %5, %6 : vector<32x1xf32>
    %8 = vector.broadcast %7 : vector<32x1xf32> to vector<32x4xf32>
    %9 = arith.subf %3, %8 : vector<32x4xf32>
    %10 = arith.mulf %9, %9 : vector<32x4xf32>
    %cst_6 = arith.constant dense<0.000000e+00> : vector<32xf32>
    %11 = vector.multi_reduction <add>, %10, %cst_6 [1] : vector<32x4xf32> to vector<32xf32>
    %12 = vector.shape_cast %11 : vector<32xf32> to vector<32x1xf32>
    %cst_7 = arith.constant 4.000000e+00 : f32
    %13 = vector.broadcast %cst_7 : f32 to vector<32x1xf32>
    %14 = arith.divf %12, %13 : vector<32x1xf32>
    %15 = vector.broadcast %7 : vector<32x1xf32> to vector<32x4xf32>
    %16 = arith.subf %3, %15 : vector<32x4xf32>
    %cst_8 = arith.constant 9.99999974E-6 : f32
    %17 = vector.broadcast %cst_8 : f32 to vector<32x1xf32>
    %18 = arith.addf %14, %17 : vector<32x1xf32>
    %19 = math.rsqrt %18 : vector<32x1xf32>
    %20 = vector.broadcast %19 : vector<32x1xf32> to vector<32x4xf32>
    %21 = arith.mulf %16, %20 : vector<32x4xf32>
    %cst_9 = arith.constant 0.000000e+00 : f32
    %22 = vector.broadcast %cst_9 : f32 to vector<32x4xf32>
    %23 = arith.maximumf %21, %22 : vector<32x4xf32>
    %c0_10 = arith.constant 0 : index
    %c0_11 = arith.constant 0 : index
    %24 = vector.load %arg4[%c0_10, %c0_11] : memref<32x7xf32, #tpu.memory_space<vmem>>, vector<32x7xf32>
    %c0_12 = arith.constant 0 : index
    %c0_13 = arith.constant 0 : index
    %c0_14 = arith.constant 0 : index
    %25 = vector.load %arg3[%c0_12, %c0_13, %c0_14] : memref<1x7x1xf32, #tpu.memory_space<vmem>>, vector<1x7x1xf32>
    %26 = vector.shape_cast %25 : vector<1x7x1xf32> to vector<7x1xf32>
    %cst_15 = arith.constant dense<0.000000e+00> : vector<32x1xf32>
    %27 = tpu.matmul %24, %26, %cst_15 {dimension_numbers = #tpu.dot_dimension_numbers<[1], [0], [0], [1], [0, 0, 1, 1], [], []>} : vector<32x7xf32>, vector<7x1xf32>, vector<32x1xf32> -> vector<32x1xf32>
    %c0_16 = arith.constant 0 : index
    %c0_17 = arith.constant 0 : index
    %28 = vector.load %arg5[%c0_16, %c0_17] : memref<32x1xf32, #tpu.memory_space<vmem>>, vector<32x1xf32>
    %29 = arith.addf %27, %28 : vector<32x1xf32>
    %cst_18 = arith.constant 0.000000e+00 : f32
    %30 = vector.broadcast %cst_18 : f32 to vector<32x1xf32>
    %31 = arith.maximumf %29, %30 : vector<32x1xf32>
    %c0_19 = arith.constant 0 : index
    %c0_20 = arith.constant 0 : index
    %32 = vector.load %arg6[%c0_19, %c0_20] : memref<32x32xf32, #tpu.memory_space<vmem>>, vector<32x32xf32>
    %cst_21 = arith.constant dense<0.000000e+00> : vector<32x1xf32>
    %33 = tpu.matmul %32, %31, %cst_21 {dimension_numbers = #tpu.dot_dimension_numbers<[1], [0], [0], [1], [0, 0, 1, 1], [], []>} : vector<32x32xf32>, vector<32x1xf32>, vector<32x1xf32> -> vector<32x1xf32>
    %c0_22 = arith.constant 0 : index
    %c0_23 = arith.constant 0 : index
    %34 = vector.load %arg7[%c0_22, %c0_23] : memref<32x1xf32, #tpu.memory_space<vmem>>, vector<32x1xf32>
    %35 = arith.addf %33, %34 : vector<32x1xf32>
    %36 = vector.broadcast %35 : vector<32x1xf32> to vector<32x4xf32>
    %37 = arith.addf %23, %36 : vector<32x4xf32>
    %c0_24 = arith.constant 0 : index
    %c0_25 = arith.constant 0 : index
    %c0_26 = arith.constant 0 : index
    %38 = vector.load %arg8[%c0_24, %c0_25, %c0_26] : memref<1x32x4xf32, #tpu.memory_space<vmem>>, vector<1x32x4xf32>
    %39 = vector.shape_cast %38 : vector<1x32x4xf32> to vector<32x4xf32>
    %40 = vector.shape_cast %37 : vector<32x4xf32> to vector<1x32x4xf32>
    tpu.vector_store %arg8[%c0_24, %c0_25, %c0_26], %40 {strides = array<i32>} : memref<1x32x4xf32, #tpu.memory_space<vmem>>, vector<1x32x4xf32>,
    return
  }
  func.func @transform_0(%arg0: i32) -> (i32, i32, i32) {
    %c0_i32 = arith.constant 0 : i32
    %c0_i32_0 = arith.constant 0 : i32
    %c0_i32_1 = arith.constant 0 : i32
    return %arg0, %c0_i32, %c0_i32_0 : i32, i32, i32
  }
  func.func @transform_1(%arg0: i32) -> (i32, i32) {
    %c0_i32 = arith.constant 0 : i32
    %c0_i32_0 = arith.constant 0 : i32
    %c0_i32_1 = arith.constant 0 : i32
    return %c0_i32, %c0_i32_0 : i32, i32
  }
  func.func @transform_2(%arg0: i32) -> (i32, i32, i32) {
    %c0_i32 = arith.constant 0 : i32
    %c0_i32_0 = arith.constant 0 : i32
    %c0_i32_1 = arith.constant 0 : i32
    return %arg0, %c0_i32, %c0_i32_0 : i32, i32, i32
  }
  func.func @transform_3(%arg0: i32) -> (i32, i32) {
    %c0_i32 = arith.constant 0 : i32
    %c0_i32_0 = arith.constant 0 : i32
    %c0_i32_1 = arith.constant 0 : i32
    return %c0_i32, %c0_i32_0 : i32, i32
  }
  func.func @transform_4(%arg0: i32) -> (i32, i32) {
    %c0_i32 = arith.constant 0 : i32
    %c0_i32_0 = arith.constant 0 : i32
    %c0_i32_1 = arith.constant 0 : i32
    return %c0_i32, %c0_i32_0 : i32, i32
  }
  func.func @transform_5(%arg0: i32) -> (i32, i32) {
    %c0_i32 = arith.constant 0 : i32
    %c0_i32_0 = arith.constant 0 : i32
    %c0_i32_1 = arith.constant 0 : i32
    return %c0_i32, %c0_i32_0 : i32, i32
  }
  func.func @transform_6(%arg0: i32) -> (i32, i32) {
    %c0_i32 = arith.constant 0 : i32
    %c0_i32_0 = arith.constant 0 : i32
    %c0_i32_1 = arith.constant 0 : i32
    return %c0_i32, %c0_i32_0 : i32, i32
  }
  func.func @transform_7(%arg0: i32) -> (i32, i32, i32) {
    %c0_i32 = arith.constant 0 : i32
    %c0_i32_0 = arith.constant 0 : i32
    %c0_i32_1 = arith.constant 0 : i32
    return %arg0, %c0_i32, %c0_i32_0 : i32, i32, i32
  }
}

module attributes {stable_mosaic.version = 11 : i64} {
  func.func @conv_in_relu_res_kernel(%arg0: i32, %arg1: memref<1x288x4xbf16, #tpu.memory_space<vmem>>, %arg2: memref<32x288xbf16, #tpu.memory_space<vmem>>, %arg3: memref<1x32x4xf32, #tpu.memory_space<vmem>>, %arg4: memref<1x32x4xf32, #tpu.memory_space<vmem>>) attributes {dimension_semantics = [#tpu.dimension_semantics<parallel>], iteration_bounds = array<i64: 2>, scalar_prefetch = 0 : i64, scratch_operands = 0 : i64, tpu.core_type = #tpu.core_type<tc>, window_params = [{transform_indices = @transform_0, window_bounds = array<i64: 1, 288, 4>}, {pipeline_mode = #tpu.pipeline_mode<synchronous>, transform_indices = @transform_1, window_bounds = array<i64: 32, 288>}, {transform_indices = @transform_2, window_bounds = array<i64: 1, 32, 4>}, {transform_indices = @transform_3, window_bounds = array<i64: 1, 32, 4>}]} {
    %c0 = arith.constant 0 : index
    %c0_0 = arith.constant 0 : index
    %0 = vector.load %arg2[%c0, %c0_0] : memref<32x288xbf16, #tpu.memory_space<vmem>>, vector<32x288xbf16>
    %c0_1 = arith.constant 0 : index
    %c0_2 = arith.constant 0 : index
    %c0_3 = arith.constant 0 : index
    %1 = vector.load %arg1[%c0_1, %c0_2, %c0_3] : memref<1x288x4xbf16, #tpu.memory_space<vmem>>, vector<1x288x4xbf16>
    %2 = vector.shape_cast %1 : vector<1x288x4xbf16> to vector<288x4xbf16>
    %cst = arith.constant dense<0.000000e+00> : vector<32x4xf32>
    %3 = tpu.matmul %0, %2, %cst {dimension_numbers = #tpu.dot_dimension_numbers<[1], [0], [0], [1], [0, 0, 1, 1], [], []>} : vector<32x288xbf16>, vector<288x4xbf16>, vector<32x4xf32> -> vector<32x4xf32>
    %c0_4 = arith.constant 0 : index
    %c0_5 = arith.constant 0 : index
    %c0_6 = arith.constant 0 : index
    %4 = vector.load %arg3[%c0_4, %c0_5, %c0_6] : memref<1x32x4xf32, #tpu.memory_space<vmem>>, vector<1x32x4xf32>
    %5 = vector.shape_cast %4 : vector<1x32x4xf32> to vector<32x4xf32>
    %cst_7 = arith.constant dense<0.000000e+00> : vector<32xf32>
    %6 = vector.multi_reduction <add>, %3, %cst_7 [1] : vector<32x4xf32> to vector<32xf32>
    %7 = vector.shape_cast %6 : vector<32xf32> to vector<32x1xf32>
    %cst_8 = arith.constant 4.000000e+00 : f32
    %8 = vector.broadcast %cst_8 : f32 to vector<32x1xf32>
    %9 = arith.divf %7, %8 : vector<32x1xf32>
    %10 = vector.broadcast %9 : vector<32x1xf32> to vector<32x4xf32>
    %11 = arith.subf %3, %10 : vector<32x4xf32>
    %12 = arith.mulf %11, %11 : vector<32x4xf32>
    %cst_9 = arith.constant dense<0.000000e+00> : vector<32xf32>
    %13 = vector.multi_reduction <add>, %12, %cst_9 [1] : vector<32x4xf32> to vector<32xf32>
    %14 = vector.shape_cast %13 : vector<32xf32> to vector<32x1xf32>
    %cst_10 = arith.constant 4.000000e+00 : f32
    %15 = vector.broadcast %cst_10 : f32 to vector<32x1xf32>
    %16 = arith.divf %14, %15 : vector<32x1xf32>
    %17 = vector.broadcast %9 : vector<32x1xf32> to vector<32x4xf32>
    %18 = arith.subf %3, %17 : vector<32x4xf32>
    %cst_11 = arith.constant 9.99999974E-6 : f32
    %19 = vector.broadcast %cst_11 : f32 to vector<32x1xf32>
    %20 = arith.addf %16, %19 : vector<32x1xf32>
    %21 = math.rsqrt %20 : vector<32x1xf32>
    %22 = vector.broadcast %21 : vector<32x1xf32> to vector<32x4xf32>
    %23 = arith.mulf %18, %22 : vector<32x4xf32>
    %cst_12 = arith.constant 0.000000e+00 : f32
    %24 = vector.broadcast %cst_12 : f32 to vector<32x4xf32>
    %25 = arith.maximumf %23, %24 : vector<32x4xf32>
    %26 = arith.addf %5, %25 : vector<32x4xf32>
    %c0_13 = arith.constant 0 : index
    %c0_14 = arith.constant 0 : index
    %c0_15 = arith.constant 0 : index
    %27 = vector.load %arg4[%c0_13, %c0_14, %c0_15] : memref<1x32x4xf32, #tpu.memory_space<vmem>>, vector<1x32x4xf32>
    %28 = vector.shape_cast %27 : vector<1x32x4xf32> to vector<32x4xf32>
    %29 = vector.shape_cast %26 : vector<32x4xf32> to vector<1x32x4xf32>
    tpu.vector_store %arg4[%c0_13, %c0_14, %c0_15], %29 {strides = array<i32>} : memref<1x32x4xf32, #tpu.memory_space<vmem>>, vector<1x32x4xf32>,
    return
  }
  func.func @transform_0(%arg0: i32) -> (i32, i32, i32) {
    %c0_i32 = arith.constant 0 : i32
    %c0_i32_0 = arith.constant 0 : i32
    %c0_i32_1 = arith.constant 0 : i32
    return %arg0, %c0_i32, %c0_i32_0 : i32, i32, i32
  }
  func.func @transform_1(%arg0: i32) -> (i32, i32) {
    %c0_i32 = arith.constant 0 : i32
    %c0_i32_0 = arith.constant 0 : i32
    %c0_i32_1 = arith.constant 0 : i32
    return %c0_i32, %c0_i32_0 : i32, i32
  }
  func.func @transform_2(%arg0: i32) -> (i32, i32, i32) {
    %c0_i32 = arith.constant 0 : i32
    %c0_i32_0 = arith.constant 0 : i32
    %c0_i32_1 = arith.constant 0 : i32
    return %arg0, %c0_i32, %c0_i32_0 : i32, i32, i32
  }
  func.func @transform_3(%arg0: i32) -> (i32, i32, i32) {
    %c0_i32 = arith.constant 0 : i32
    %c0_i32_0 = arith.constant 0 : i32
    %c0_i32_1 = arith.constant 0 : i32
    return %arg0, %c0_i32, %c0_i32_0 : i32, i32, i32
  }
}

module attributes {stable_mosaic.version = 11 : i64} {
  func.func @conv_in_relu_kernel(%arg0: i32, %arg1: memref<1x288x16xbf16, #tpu.memory_space<vmem>>, %arg2: memref<16x288xbf16, #tpu.memory_space<vmem>>, %arg3: memref<1x16x16xf32, #tpu.memory_space<vmem>>) attributes {dimension_semantics = [#tpu.dimension_semantics<parallel>], iteration_bounds = array<i64: 2>, scalar_prefetch = 0 : i64, scratch_operands = 0 : i64, tpu.core_type = #tpu.core_type<tc>, window_params = [{transform_indices = @transform_0, window_bounds = array<i64: 1, 288, 16>}, {pipeline_mode = #tpu.pipeline_mode<synchronous>, transform_indices = @transform_1, window_bounds = array<i64: 16, 288>}, {transform_indices = @transform_2, window_bounds = array<i64: 1, 16, 16>}]} {
    %c0 = arith.constant 0 : index
    %c0_0 = arith.constant 0 : index
    %0 = vector.load %arg2[%c0, %c0_0] : memref<16x288xbf16, #tpu.memory_space<vmem>>, vector<16x288xbf16>
    %c0_1 = arith.constant 0 : index
    %c0_2 = arith.constant 0 : index
    %c0_3 = arith.constant 0 : index
    %1 = vector.load %arg1[%c0_1, %c0_2, %c0_3] : memref<1x288x16xbf16, #tpu.memory_space<vmem>>, vector<1x288x16xbf16>
    %2 = vector.shape_cast %1 : vector<1x288x16xbf16> to vector<288x16xbf16>
    %cst = arith.constant dense<0.000000e+00> : vector<16x16xf32>
    %3 = tpu.matmul %0, %2, %cst {dimension_numbers = #tpu.dot_dimension_numbers<[1], [0], [0], [1], [0, 0, 1, 1], [], []>} : vector<16x288xbf16>, vector<288x16xbf16>, vector<16x16xf32> -> vector<16x16xf32>
    %cst_4 = arith.constant dense<0.000000e+00> : vector<16xf32>
    %4 = vector.multi_reduction <add>, %3, %cst_4 [1] : vector<16x16xf32> to vector<16xf32>
    %5 = vector.shape_cast %4 : vector<16xf32> to vector<16x1xf32>
    %cst_5 = arith.constant 1.600000e+01 : f32
    %6 = vector.broadcast %cst_5 : f32 to vector<16x1xf32>
    %7 = arith.divf %5, %6 : vector<16x1xf32>
    %8 = vector.broadcast %7 : vector<16x1xf32> to vector<16x16xf32>
    %9 = arith.subf %3, %8 : vector<16x16xf32>
    %10 = arith.mulf %9, %9 : vector<16x16xf32>
    %cst_6 = arith.constant dense<0.000000e+00> : vector<16xf32>
    %11 = vector.multi_reduction <add>, %10, %cst_6 [1] : vector<16x16xf32> to vector<16xf32>
    %12 = vector.shape_cast %11 : vector<16xf32> to vector<16x1xf32>
    %cst_7 = arith.constant 1.600000e+01 : f32
    %13 = vector.broadcast %cst_7 : f32 to vector<16x1xf32>
    %14 = arith.divf %12, %13 : vector<16x1xf32>
    %15 = vector.broadcast %7 : vector<16x1xf32> to vector<16x16xf32>
    %16 = arith.subf %3, %15 : vector<16x16xf32>
    %cst_8 = arith.constant 9.99999974E-6 : f32
    %17 = vector.broadcast %cst_8 : f32 to vector<16x1xf32>
    %18 = arith.addf %14, %17 : vector<16x1xf32>
    %19 = math.rsqrt %18 : vector<16x1xf32>
    %20 = vector.broadcast %19 : vector<16x1xf32> to vector<16x16xf32>
    %21 = arith.mulf %16, %20 : vector<16x16xf32>
    %cst_9 = arith.constant 0.000000e+00 : f32
    %22 = vector.broadcast %cst_9 : f32 to vector<16x16xf32>
    %23 = arith.maximumf %21, %22 : vector<16x16xf32>
    %c0_10 = arith.constant 0 : index
    %c0_11 = arith.constant 0 : index
    %c0_12 = arith.constant 0 : index
    %24 = vector.load %arg3[%c0_10, %c0_11, %c0_12] : memref<1x16x16xf32, #tpu.memory_space<vmem>>, vector<1x16x16xf32>
    %25 = vector.shape_cast %24 : vector<1x16x16xf32> to vector<16x16xf32>
    %26 = vector.shape_cast %23 : vector<16x16xf32> to vector<1x16x16xf32>
    tpu.vector_store %arg3[%c0_10, %c0_11, %c0_12], %26 {strides = array<i32>} : memref<1x16x16xf32, #tpu.memory_space<vmem>>, vector<1x16x16xf32>,
    return
  }
  func.func @transform_0(%arg0: i32) -> (i32, i32, i32) {
    %c0_i32 = arith.constant 0 : i32
    %c0_i32_0 = arith.constant 0 : i32
    %c0_i32_1 = arith.constant 0 : i32
    return %arg0, %c0_i32, %c0_i32_0 : i32, i32, i32
  }
  func.func @transform_1(%arg0: i32) -> (i32, i32) {
    %c0_i32 = arith.constant 0 : i32
    %c0_i32_0 = arith.constant 0 : i32
    %c0_i32_1 = arith.constant 0 : i32
    return %c0_i32, %c0_i32_0 : i32, i32
  }
  func.func @transform_2(%arg0: i32) -> (i32, i32, i32) {
    %c0_i32 = arith.constant 0 : i32
    %c0_i32_0 = arith.constant 0 : i32
    %c0_i32_1 = arith.constant 0 : i32
    return %arg0, %c0_i32, %c0_i32_0 : i32, i32, i32
  }
}

module attributes {stable_mosaic.version = 11 : i64} {
  func.func @conv_in_relu_kernel(%arg0: i32, %arg1: memref<1x144x64xbf16, #tpu.memory_space<vmem>>, %arg2: memref<8x144xbf16, #tpu.memory_space<vmem>>, %arg3: memref<1x8x64xf32, #tpu.memory_space<vmem>>) attributes {dimension_semantics = [#tpu.dimension_semantics<parallel>], iteration_bounds = array<i64: 2>, scalar_prefetch = 0 : i64, scratch_operands = 0 : i64, tpu.core_type = #tpu.core_type<tc>, window_params = [{transform_indices = @transform_0, window_bounds = array<i64: 1, 144, 64>}, {pipeline_mode = #tpu.pipeline_mode<synchronous>, transform_indices = @transform_1, window_bounds = array<i64: 8, 144>}, {transform_indices = @transform_2, window_bounds = array<i64: 1, 8, 64>}]} {
    %c0 = arith.constant 0 : index
    %c0_0 = arith.constant 0 : index
    %0 = vector.load %arg2[%c0, %c0_0] : memref<8x144xbf16, #tpu.memory_space<vmem>>, vector<8x144xbf16>
    %c0_1 = arith.constant 0 : index
    %c0_2 = arith.constant 0 : index
    %c0_3 = arith.constant 0 : index
    %1 = vector.load %arg1[%c0_1, %c0_2, %c0_3] : memref<1x144x64xbf16, #tpu.memory_space<vmem>>, vector<1x144x64xbf16>
    %2 = vector.shape_cast %1 : vector<1x144x64xbf16> to vector<144x64xbf16>
    %cst = arith.constant dense<0.000000e+00> : vector<8x64xf32>
    %3 = tpu.matmul %0, %2, %cst {dimension_numbers = #tpu.dot_dimension_numbers<[1], [0], [0], [1], [0, 0, 1, 1], [], []>} : vector<8x144xbf16>, vector<144x64xbf16>, vector<8x64xf32> -> vector<8x64xf32>
    %cst_4 = arith.constant dense<0.000000e+00> : vector<8xf32>
    %4 = vector.multi_reduction <add>, %3, %cst_4 [1] : vector<8x64xf32> to vector<8xf32>
    %5 = vector.shape_cast %4 : vector<8xf32> to vector<8x1xf32>
    %cst_5 = arith.constant 6.400000e+01 : f32
    %6 = vector.broadcast %cst_5 : f32 to vector<8x1xf32>
    %7 = arith.divf %5, %6 : vector<8x1xf32>
    %8 = vector.broadcast %7 : vector<8x1xf32> to vector<8x64xf32>
    %9 = arith.subf %3, %8 : vector<8x64xf32>
    %10 = arith.mulf %9, %9 : vector<8x64xf32>
    %cst_6 = arith.constant dense<0.000000e+00> : vector<8xf32>
    %11 = vector.multi_reduction <add>, %10, %cst_6 [1] : vector<8x64xf32> to vector<8xf32>
    %12 = vector.shape_cast %11 : vector<8xf32> to vector<8x1xf32>
    %cst_7 = arith.constant 6.400000e+01 : f32
    %13 = vector.broadcast %cst_7 : f32 to vector<8x1xf32>
    %14 = arith.divf %12, %13 : vector<8x1xf32>
    %15 = vector.broadcast %7 : vector<8x1xf32> to vector<8x64xf32>
    %16 = arith.subf %3, %15 : vector<8x64xf32>
    %cst_8 = arith.constant 9.99999974E-6 : f32
    %17 = vector.broadcast %cst_8 : f32 to vector<8x1xf32>
    %18 = arith.addf %14, %17 : vector<8x1xf32>
    %19 = math.rsqrt %18 : vector<8x1xf32>
    %20 = vector.broadcast %19 : vector<8x1xf32> to vector<8x64xf32>
    %21 = arith.mulf %16, %20 : vector<8x64xf32>
    %cst_9 = arith.constant 0.000000e+00 : f32
    %22 = vector.broadcast %cst_9 : f32 to vector<8x64xf32>
    %23 = arith.maximumf %21, %22 : vector<8x64xf32>
    %c0_10 = arith.constant 0 : index
    %c0_11 = arith.constant 0 : index
    %c0_12 = arith.constant 0 : index
    %24 = vector.load %arg3[%c0_10, %c0_11, %c0_12] : memref<1x8x64xf32, #tpu.memory_space<vmem>>, vector<1x8x64xf32>
    %25 = vector.shape_cast %24 : vector<1x8x64xf32> to vector<8x64xf32>
    %26 = vector.shape_cast %23 : vector<8x64xf32> to vector<1x8x64xf32>
    tpu.vector_store %arg3[%c0_10, %c0_11, %c0_12], %26 {strides = array<i32>} : memref<1x8x64xf32, #tpu.memory_space<vmem>>, vector<1x8x64xf32>,
    return
  }
  func.func @transform_0(%arg0: i32) -> (i32, i32, i32) {
    %c0_i32 = arith.constant 0 : i32
    %c0_i32_0 = arith.constant 0 : i32
    %c0_i32_1 = arith.constant 0 : i32
    return %arg0, %c0_i32, %c0_i32_0 : i32, i32, i32
  }
  func.func @transform_1(%arg0: i32) -> (i32, i32) {
    %c0_i32 = arith.constant 0 : i32
    %c0_i32_0 = arith.constant 0 : i32
    %c0_i32_1 = arith.constant 0 : i32
    return %c0_i32, %c0_i32_0 : i32, i32
  }
  func.func @transform_2(%arg0: i32) -> (i32, i32, i32) {
    %c0_i32 = arith.constant 0 : i32
    %c0_i32_0 = arith.constant 0 : i32
    %c0_i32_1 = arith.constant 0 : i32
    return %arg0, %c0_i32, %c0_i32_0 : i32, i32, i32
  }
}

module attributes {stable_mosaic.version = 11 : i64} {
  func.func @conv_bias_tanh_kernel(%arg0: i32, %arg1: memref<1x72x256xbf16, #tpu.memory_space<vmem>>, %arg2: memref<3x72xbf16, #tpu.memory_space<vmem>>, %arg3: memref<3x1xf32, #tpu.memory_space<vmem>>, %arg4: memref<1x3x256xf32, #tpu.memory_space<vmem>>) attributes {dimension_semantics = [#tpu.dimension_semantics<parallel>], iteration_bounds = array<i64: 2>, scalar_prefetch = 0 : i64, scratch_operands = 0 : i64, tpu.core_type = #tpu.core_type<tc>, window_params = [{transform_indices = @transform_0, window_bounds = array<i64: 1, 72, 256>}, {pipeline_mode = #tpu.pipeline_mode<synchronous>, transform_indices = @transform_1, window_bounds = array<i64: 3, 72>}, {pipeline_mode = #tpu.pipeline_mode<synchronous>, transform_indices = @transform_2, window_bounds = array<i64: 3, 1>}, {transform_indices = @transform_3, window_bounds = array<i64: 1, 3, 256>}]} {
    %c0 = arith.constant 0 : index
    %c0_0 = arith.constant 0 : index
    %0 = vector.load %arg2[%c0, %c0_0] : memref<3x72xbf16, #tpu.memory_space<vmem>>, vector<3x72xbf16>
    %c0_1 = arith.constant 0 : index
    %c0_2 = arith.constant 0 : index
    %c0_3 = arith.constant 0 : index
    %1 = vector.load %arg1[%c0_1, %c0_2, %c0_3] : memref<1x72x256xbf16, #tpu.memory_space<vmem>>, vector<1x72x256xbf16>
    %2 = vector.shape_cast %1 : vector<1x72x256xbf16> to vector<72x256xbf16>
    %cst = arith.constant dense<0.000000e+00> : vector<3x256xf32>
    %3 = tpu.matmul %0, %2, %cst {dimension_numbers = #tpu.dot_dimension_numbers<[1], [0], [0], [1], [0, 0, 1, 1], [], []>} : vector<3x72xbf16>, vector<72x256xbf16>, vector<3x256xf32> -> vector<3x256xf32>
    %c0_4 = arith.constant 0 : index
    %c0_5 = arith.constant 0 : index
    %4 = vector.load %arg3[%c0_4, %c0_5] : memref<3x1xf32, #tpu.memory_space<vmem>>, vector<3x1xf32>
    %5 = vector.broadcast %4 : vector<3x1xf32> to vector<3x256xf32>
    %6 = arith.addf %3, %5 : vector<3x256xf32>
    %7 = math.tanh %6 : vector<3x256xf32>
    %c0_6 = arith.constant 0 : index
    %c0_7 = arith.constant 0 : index
    %c0_8 = arith.constant 0 : index
    %8 = vector.load %arg4[%c0_6, %c0_7, %c0_8] : memref<1x3x256xf32, #tpu.memory_space<vmem>>, vector<1x3x256xf32>
    %9 = vector.shape_cast %8 : vector<1x3x256xf32> to vector<3x256xf32>
    %10 = vector.shape_cast %7 : vector<3x256xf32> to vector<1x3x256xf32>
    tpu.vector_store %arg4[%c0_6, %c0_7, %c0_8], %10 {strides = array<i32>} : memref<1x3x256xf32, #tpu.memory_space<vmem>>, vector<1x3x256xf32>,
    return
  }
  func.func @transform_0(%arg0: i32) -> (i32, i32, i32) {
    %c0_i32 = arith.constant 0 : i32
    %c0_i32_0 = arith.constant 0 : i32
    %c0_i32_1 = arith.constant 0 : i32
    return %arg0, %c0_i32, %c0_i32_0 : i32, i32, i32
  }
  func.func @transform_1(%arg0: i32) -> (i32, i32) {
    %c0_i32 = arith.constant 0 : i32
    %c0_i32_0 = arith.constant 0 : i32
    %c0_i32_1 = arith.constant 0 : i32
    return %c0_i32, %c0_i32_0 : i32, i32
  }
  func.func @transform_2(%arg0: i32) -> (i32, i32) {
    %c0_i32 = arith.constant 0 : i32
    %c0_i32_0 = arith.constant 0 : i32
    %c0_i32_1 = arith.constant 0 : i32
    return %c0_i32, %c0_i32_0 : i32, i32
  }
  func.func @transform_3(%arg0: i32) -> (i32, i32, i32) {
    %c0_i32 = arith.constant 0 : i32
    %c0_i32_0 = arith.constant 0 : i32
    %c0_i32_1 = arith.constant 0 : i32
    return %arg0, %c0_i32, %c0_i32_0 : i32, i32, i32
  }
}

</mosaic_0001>

<bundles_post_ra>
// kernel: generator_forward.9
= control target key start
LH: loop header
LB: loop body
LE: loop exit
PB: predicated region body
PF: predicated region fallthrough
CT: control target
= control target key end

     0   :  { %s350_s9 = smov 0   ;;  %s377_s0 = inlined_call_operand.vmem [shape: bf16[2,48,64], index: 0, kind: input, shape index: {}]   ;;  %s378_s1 = inlined_call_operand.vmem [shape: bf16[8,48], index: 1, kind: input, shape index: {}]   ;;  %s379_s2 = inlined_call_operand.vmem [shape: f32[2,8,64], index: 2, kind: output, shape index: {}]  }
   0x1 LB: > { %s282_s10 = sadd.s32 4294967295, %s331_s9   ;;  %p286_p0 = scmp.ge.s32.totalorder %s331_s9, 1  ;;  %s331_s9 = sphi %s350_s9, %s12_s9  }
   0x2   : > { %p112_p1 = scmp.lt.s32.totalorder %s331_s9, 3 }
   0x4   : > { %p113_p2 = pnand %p286_p0, %p112_p1 }
   0x5   : > { %p133_p3 = scmp.lt.s32.totalorder (!%p113_p2), %s282_s10, 1  ;;  %v333_v0 = vmov (!%p113_p2), 0.0   ;;  %vm334_vm0 = vmmov (!%p113_p2), 0   ;;  %v143_v4 = vld [vmem:[%s378_s1] sm:$0xf] (!%p113_p2)  ;;  %vm168_vm1 = vcmask (!%p113_p2), 392192  }
   0x6   : > { %116 = sbr.rel (%p113_p2) target bundleno = 553 (0x229), region = 28  ;;  %299 = vmatprep.subr.bf16.mxu0 (!%p113_p2), %v333_v0  ;;  %305 = vmatprep.mubr.msk.bf16.mxu0 (!%p113_p2), %vm334_vm0, %v333_v0  ;;  %vm212_vm2 = vcmask (!%p113_p2), 523264  }
   0xd   : > { %s381_s10 = smov (!%p133_p3, %s282_s10), 1 }
   0xe   : > { %s309_s11 = smul.u32 24, %s381_s10  ;;  %s288_s17 = sshll.u32 %s381_s10, 3 }
   0xf   : > { %s141_s20 = scalar_lea.vmem %s379_s2, %s288_s17 }
  0x10   : > { %s137_s14 = scalar_lea.vmem %s377_s0, %s309_s11 }
  0x11   : > { %v320_v1 = vld [vmem:[%s137_s14] sm:$0xff]   ;;  %v321_v2 = vld [vmem:[%s137_s14 + $0x8] sm:$0xff]   ;;  %v322_v3 = vld [vmem:[%s137_s14 + $0x10] sm:$0xff]  }
  0x12   : > { %300 = vmatpush3.bf16.msra.mxu0 %v320_v1 }
  0x13   : > { %301 = vmatprep.subr.bf16.mxu0 %v333_v0 }
  0x16   : > { %302 = vmatpush3.bf16.msra.mxu0 %v321_v2 }
  0x17   : > { %303 = vmatprep.subr.bf16.mxu0 %v333_v0 }
  0x1a   : > { %304 = vmatpush3.bf16.msra.mxu0 %v322_v3 }
  0x1d   : > { %306 = vmatmul.mubr.msk.bf16.vlgmr.msra.gmra.mrb[0].mxu0 %vm168_vm1, %v143_v4 }
  0xf0   : > { %v206_v5 = vpop.f32.mrb[0].mxu0 }
  0xf1   : > { %v307_v6 = vpop.f32.mrb[1].mxu0  ;;  %v213_v7 = vsel %vm212_vm2, %v206_v5, 0.0 }
  0xf2   : > { %214 = vadd.xlane.f32.xlu0 %v213_v7  ;;  %v209_v8 = vpop.f32.mrb[2].mxu0 }
  0xf3   : > { %v308_v9 = vpop.f32.mrb[3].mxu0 }
 0x17f   : > { %v215_v10 = vpop.xlane.xlu0 %214 }
 0x180   : > { %v217_v11 = vmul.f32 0.015625, %v215_v10 }
 0x182   : > { %v218_v12 = vsub.f32 %v206_v5, %v217_v11 }
 0x184   : > { %v219_v13 = vmul.f32 %v218_v12, %v218_v12 }
 0x186   : > { %v220_v14 = vsel %vm212_vm2, %v219_v13, 0.0 }
 0x187   : > { %221 = vadd.xlane.f32.xlu0 %v220_v14 }
 0x214   : > { %v222_v15 = vpop.xlane.xlu0 %221 }
 0x215   : > { %v223_v16 = vmul.f32 0.015625, %v222_v15 }
 0x217   : > { %v224_v17 = vadd.f32 1e-05, %v223_v16 }
 0x219   : > { %323 = vrsqrt.f32 %v224_v17 }
 0x223   : > { %v324_v18 = vpop.eup %323 }
 0x224   : > { %v226_v19 = vmul.f32 %v324_v18, %v218_v12 }
 0x226   : > { %v227_v20 = vmax.f32 %v226_v19, 0.0 }
 0x228   : > { %228 = vst.msk [vmem:[%s141_s20] sm:$0xff] %vm212_vm2, %v227_v20 }
 0x229 PF: > { %s12_s9 = sadd.s32 1, %s331_s9  }
 0x22a   : > { %p9_p4 = scmp.ge.s32.totalorder %s12_s9, 4  }
 0x22c   :  { %11 = sbr.rel (!%p9_p4) target bundleno = 1 (0x1), region = 58 }

// kernel: generator_forward.10
= control target key start
LH: loop header
LB: loop body
LE: loop exit
PB: predicated region body
PF: predicated region fallthrough
CT: control target
= control target key end

     0   :  { %s444_s9 = smov 0   ;;  %s474_s0 = inlined_call_operand.vmem [shape: bf16[2,128,16], index: 0, kind: input, shape index: {}]   ;;  %s475_s1 = inlined_call_operand.vmem [shape: bf16[16,128], index: 1, kind: input, shape index: {}]   ;;  %s476_s2 = inlined_call_operand.vmem [shape: f32[2,16,16], index: 2, kind: output, shape index: {}]  }
   0x1 LB: > { %s345_s10 = sadd.s32 4294967295, %s425_s9   ;;  %p349_p0 = scmp.ge.s32.totalorder %s425_s9, 1  ;;  %s425_s9 = sphi %s444_s9, %s12_s9  }
   0x2   : > { %p112_p1 = scmp.lt.s32.totalorder %s425_s9, 3 }
   0x4   : > { %p113_p2 = pnand %p349_p0, %p112_p1 }
   0x5   : > { %p134_p3 = scmp.lt.s32.totalorder (!%p113_p2), %s345_s10, 1  ;;  %v427_v0 = vmov (!%p113_p2), 0.0   ;;  %vm428_vm0 = vmmov (!%p113_p2), 0   ;;  %v414_v9 = vld [vmem:[%s475_s1] sm:$0xff] (!%p113_p2)   ;;  %vm258_vm1 = vcmask (!%p113_p2), 130048  }
   0x6   : > { %116 = sbr.rel (%p113_p2) target bundleno = 576 (0x240), region = 28  ;;  %376 = vmatprep.subr.bf16.mxu0 (!%p113_p2), %v427_v0  ;;  %392 = vmatprep.mubr.msk.bf16.mxu0 (!%p113_p2), %vm428_vm0, %v427_v0 }
   0xd   : > { %s478_s10 = smov (!%p134_p3, %s345_s10), 1 }
   0xe   : > { %s365_s11 = sshll.u32 %s478_s10, 6  ;;  %s366_s17 = sshll.u32 %s478_s10, 4 }
   0xf   : > { %s138_s14 = scalar_lea.vmem %s474_s0, %s365_s11  ;;  %s143_s20 = scalar_lea.vmem %s476_s2, %s366_s17 }
  0x10   : > { %v406_v1 = vld [vmem:[%s138_s14] sm:$0xff]   ;;  %v407_v2 = vld [vmem:[%s138_s14 + $0x8] sm:$0xff]   ;;  %v408_v3 = vld [vmem:[%s138_s14 + $0x10] sm:$0xff]  }
  0x11   : > { %377 = vmatpush3.bf16.msra.mxu0 %v406_v1  ;;  %v409_v4 = vld [vmem:[%s138_s14 + $0x18] sm:$0xff]   ;;  %v410_v5 = vld [vmem:[%s138_s14 + $0x20] sm:$0xff]   ;;  %v411_v6 = vld [vmem:[%s138_s14 + $0x28] sm:$0xff]  }
  0x12   : > { %378 = vmatprep.subr.bf16.mxu0 %v427_v0  ;;  %v412_v7 = vld [vmem:[%s138_s14 + $0x30] sm:$0xff]   ;;  %v413_v8 = vld [vmem:[%s138_s14 + $0x38] sm:$0xff]  }
  0x15   : > { %379 = vmatpush3.bf16.msra.mxu0 %v407_v2 }
  0x16   : > { %380 = vmatprep.subr.bf16.mxu0 %v427_v0 }
  0x19   : > { %381 = vmatpush3.bf16.msra.mxu0 %v408_v3 }
  0x1a   : > { %382 = vmatprep.subr.bf16.mxu0 %v427_v0 }
  0x1d   : > { %383 = vmatpush3.bf16.msra.mxu0 %v409_v4 }
  0x1e   : > { %384 = vmatprep.subr.bf16.mxu0 %v427_v0 }
  0x21   : > { %385 = vmatpush3.bf16.msra.mxu0 %v410_v5 }
  0x22   : > { %386 = vmatprep.subr.bf16.mxu0 %v427_v0 }
  0x25   : > { %387 = vmatpush3.bf16.msra.mxu0 %v411_v6 }
  0x26   : > { %388 = vmatprep.subr.bf16.mxu0 %v427_v0 }
  0x29   : > { %389 = vmatpush3.bf16.msra.mxu0 %v412_v7 }
  0x2a   : > { %390 = vmatprep.subr.bf16.mxu0 %v427_v0 }
  0x2d   : > { %391 = vmatpush3.bf16.msra.mxu0 %v413_v8 }
  0x30   : > { %393 = vmatmul.mubr.bf16.vlgmr.msra.gmra.mrb[0].mxu0 %v414_v9 }
 0x103   : > { %v251_v10 = vpop.f32.mrb[0].mxu0 }
 0x104   : > { %v394_v11 = vpop.f32.mrb[1].mxu0  ;;  %v259_v12 = vsel %vm258_vm1, %v251_v10, 0.0 }
 0x105   : > { %260 = vadd.xlane.f32.xlu0 %v259_v12  ;;  %v254_v13 = vpop.f32.mrb[2].mxu0 }
 0x106   : > { %v395_v14 = vpop.f32.mrb[3].mxu0  ;;  %v262_v15 = vsel %vm258_vm1, %v254_v13, 0.0 }
 0x109   : > { %263 = vadd.xlane.f32.xlu0 %v262_v15 }
 0x192   : > { %v261_v16 = vpop.xlane.xlu0 %260 }
 0x193   : > { %v266_v17 = vmul.f32 0.0625, %v261_v16 }
 0x195   : > { %v268_v18 = vsub.f32 %v251_v10, %v266_v17 }
 0x196   : > { %v264_v19 = vpop.xlane.xlu0 %263 }
 0x197   : > { %v267_v20 = vmul.f32 0.0625, %v264_v19  ;;  %v270_v21 = vmul.f32 %v268_v18, %v268_v18 }
 0x199   : > { %v269_v22 = vsub.f32 %v254_v13, %v267_v20  ;;  %v272_v23 = vsel %vm258_vm1, %v270_v21, 0.0 }
 0x19a   : > { %273 = vadd.xlane.f32.xlu1 %v272_v23 }
 0x19b   : > { %v271_v24 = vmul.f32 %v269_v22, %v269_v22 }
 0x19d   : > { %v275_v25 = vsel %vm258_vm1, %v271_v24, 0.0 }
 0x19e   : > { %276 = vadd.xlane.f32.xlu1 %v275_v25 }
 0x227   : > { %v274_v26 = vpop.xlane.xlu1 %273 }
 0x228   : > { %v278_v27 = vmul.f32 0.0625, %v274_v26 }
 0x22a   : > { %v280_v28 = vadd.f32 1e-05, %v278_v27 }
 0x22b   : > { %v277_v29 = vpop.xlane.xlu1 %276 }
 0x22c   : > { %415 = vrsqrt.f32 %v280_v28  ;;  %v279_v30 = vmul.f32 0.0625, %v277_v29 }
 0x22e   : > { %v281_v31 = vadd.f32 1e-05, %v279_v30 }
 0x230   : > { %417 = vrsqrt.f32 %v281_v31 }
 0x236   : > { %v416_v32 = vpop.eup %415 }
 0x237   : > { %v284_v33 = vmul.f32 %v416_v32, %v268_v18 }
 0x239   : > { %v286_v34 = vmax.f32 %v284_v33, 0.0 }
 0x23a   : > { %v418_v35 = vpop.eup %417 }
 0x23b   : > { %288 = vst.msk [vmem:[%s143_s20] sm:$0xff] %vm258_vm1, %v286_v34  ;;  %v285_v36 = vmul.f32 %v418_v35, %v269_v22 }
 0x23d   : > { %v287_v37 = vmax.f32 %v285_v36, 0.0 }
 0x23f   : > { %289 = vst.msk [vmem:[%s143_s20 + $0x8] sm:$0xff] %vm258_vm1, %v287_v37 }
 0x240 PF: > { %s12_s9 = sadd.s32 1, %s425_s9  }
 0x241   : > { %p9_p4 = scmp.ge.s32.totalorder %s12_s9, 4  }
 0x243   :  { %11 = sbr.rel (!%p9_p4) target bundleno = 1 (0x1), region = 58 }

// kernel: generator_forward.11
= control target key start
LH: loop header
LB: loop body
LE: loop exit
PB: predicated region body
PF: predicated region fallthrough
CT: control target
= control target key end

     0   :  { %s1076_s24 = smov 0   ;;  %s1199_s0 = inlined_call_operand.vmem [shape: bf16[2,256,4], index: 0, kind: input, shape index: {}]   ;;  %s1200_s1 = inlined_call_operand.vmem [shape: bf16[32,256], index: 1, kind: input, shape index: {}]   ;;  %s1201_s2 = inlined_call_operand.vmem [shape: f32[2,7,1], index: 2, kind: input, shape index: {}]   ;;  %s1202_s3 = inlined_call_operand.vmem [shape: f32[32,7], index: 3, kind: input, shape index: {}]   ;;  %s1203_s4 = inlined_call_operand.vmem [shape: f32[32,1], index: 4, kind: input, shape index: {}]   ;;  %s1204_s5 = inlined_call_operand.vmem [shape: f32[32,32], index: 5, kind: input, shape index: {}]   ;;  %s1205_s6 = inlined_call_operand.vmem [shape: f32[32,1], index: 6, kind: input, shape index: {}]   ;;  %s1206_s7 = inlined_call_operand.vmem [shape: f32[2,32,4], index: 7, kind: output, shape index: {}]  }
   0x1 LB: > { %s872_s25 = sadd.s32 4294967295, %s1033_s24   ;;  %p876_p0 = scmp.ge.s32.totalorder %s1033_s24, 1  ;;  %s1033_s24 = sphi %s1076_s24, %s17_s24  }
   0x2   : > { %p246_p1 = scmp.lt.s32.totalorder %s1033_s24, 3 }
   0x4   : > { %p247_p2 = pnand %p876_p0, %p246_p1 }
   0x5   : > { %p282_p3 = scmp.lt.s32.totalorder (!%p247_p2), %s872_s25, 1  ;;  %v556_v0 = vld [vmem:[%s1202_s3] sm:$0xff] (!%p247_p2)  ;;  %vm565_vm0 = vcmask (!%p247_p2), 56320   ;;  %vm578_vm1 = vcmask (!%p247_p2), 1046528   ;;  %v557_v2 = vld [vmem:[%s1202_s3 + $0x8] sm:$0xff] (!%p247_p2)  ;;  %v558_v3 = vld [vmem:[%s1202_s3 + $0x10] sm:$0xff] (!%p247_p2) }
   0x6   : > { %250 = sbr.rel (%p247_p2) target bundleno = 600 (0x258), region = 48  ;;  %958 = vmatprep.mubr.msk.f32.mxu1 (!%p247_p2), %vm565_vm0, %v556_v0  ;;  %v1015_v1 = vld [vmem:[%s1200_s1 + $0x4] ss:$8 sps:$4 sm:$0xff] (!%p247_p2)   ;;  %v559_v7 = vld [vmem:[%s1202_s3 + $0x18] sm:$0xff] (!%p247_p2)  ;;  %v1013_v22 = vld [vmem:[%s1200_s1] ss:$8 sps:$4 sm:$0xff] (!%p247_p2)  }
   0x7   : > { %481 = vmatprep.mubr.bf16.mxu0 (!%p247_p2), %v1015_v1  ;;  %v1016_v23 = vld [vmem:[%s1200_s1 + $0x14] ss:$8 sps:$4 sm:$0xff] (!%p247_p2)   ;;  %v1018_v24 = vld [vmem:[%s1200_s1 + $0x10] ss:$8 sps:$4 sm:$0xff] (!%p247_p2)   ;;  %v671_v25 = vld [vmem:[%s1204_s5] sm:$0xff] (!%p247_p2)  ;;  %vm679_vm2 = vcmask (!%p247_p2), 261120  }
   0x8   : > { %v562_v26 = vld [vmem:[%s1203_s4 + $0x8] sm:$0xff] (!%p247_p2)  ;;  %v561_v27 = vld [vmem:[%s1203_s4] sm:$0xff] (!%p247_p2)  ;;  %v564_v32 = vld [vmem:[%s1203_s4 + $0x18] sm:$0xff] (!%p247_p2)  ;;  %vm498_vm3 = vcmask (!%p247_p2), 31744   ;;  %v1035_v63 = vmov (!%p247_p2), 0  }
   0x9   : > { %v563_v34 = vld [vmem:[%s1203_s4 + $0x10] sm:$0xff] (!%p247_p2)  ;;  %v672_v44 = vld [vmem:[%s1204_s5 + $0x8] sm:$0xff] (!%p247_p2)  ;;  %v674_v46 = vld [vmem:[%s1204_s5 + $0x18] sm:$0xff] (!%p247_p2)  ;;  %996 = vset.pattern.permute.xlu1 (!%p247_p2), %v1035_v63  ;;  %995 = vset.pattern.permute.xlu0 (!%p247_p2), %v1035_v63 }
   0xa   : > { %v673_v45 = vld [vmem:[%s1204_s5 + $0x10] sm:$0xff] (!%p247_p2) }
   0xd   : > { %s1208_s25 = smov (!%p282_p3, %s872_s25), 1 }
   0xe   : > { %s913_s30 = sshll.u32 %s1208_s25, 7  ;;  %s879_s8 = sshll.u32 %s1208_s25, 3 }
   0xf   : > { %s1098_s11 = scalar_lea.vmem %s1199_s0, %s913_s30  ;;  %s290_s14 = scalar_lea.vmem %s1201_s2, %s879_s8 }
  0x10   : > { %v560_v4 = vld [vmem:[%s290_s14] sm:$0x7f]  ;;  %v999_v8 = vld [vmem:[%s1098_s11 + $0x48] sm:$0xff]   ;;  %v1001_v10 = vld [vmem:[%s1098_s11 + $0x50] sm:$0xff]   ;;  %s914_s9 = sshll.u32 %s1208_s25, 5 }
  0x11   : > { %956 = vmatprep.subr.msk.mxu1 %vm578_vm1, %v560_v4  ;;  %v997_v5 = vld [vmem:[%s1098_s11 + $0x40] sm:$0xff]   ;;  %v1000_v9 = vld [vmem:[%s1098_s11 + $0x8] sm:$0xff]   ;;  %v1002_v11 = vld [vmem:[%s1098_s11 + $0x10] sm:$0xff]   ;;  %s295_s12 = scalar_lea.vmem %s1206_s7, %s914_s9 }
  0x12   : > { %957 = vmatpush3.msk.msra.mxu1 %vm578_vm1, %v560_v4  ;;  %v998_v6 = vld [vmem:[%s1098_s11] sm:$0xff]   ;;  %915 = vmatprep.subr.bf16.mxu0 %v997_v5  ;;  %v1003_v12 = vld [vmem:[%s1098_s11 + $0x58] sm:$0xff]   ;;  %v1007_v16 = vld [vmem:[%s1098_s11 + $0x68] sm:$0xff]  }
  0x13   : > { %959 = vmatmul.mubr.msk.f32.vlgmr.msra.gmra.mrb[0].mxu1 %vm565_vm0, %v557_v2  ;;  %916 = vmatpush3.bf16.msra.mxu0 %v998_v6  ;;  %v1004_v13 = vld [vmem:[%s1098_s11 + $0x18] sm:$0xff]   ;;  %v1005_v14 = vld [vmem:[%s1098_s11 + $0x60] sm:$0xff]   ;;  %v1008_v17 = vld [vmem:[%s1098_s11 + $0x28] sm:$0xff]  }
  0x14   : > { %961 = vmatprep.mubr.msk.f32.mxu1 %vm565_vm0, %v558_v3  ;;  %917 = vmatprep.subr.bf16.mxu0 %v999_v8  ;;  %v1006_v15 = vld [vmem:[%s1098_s11 + $0x20] sm:$0xff]   ;;  %v1009_v18 = vld [vmem:[%s1098_s11 + $0x70] sm:$0xff]   ;;  %v1011_v20 = vld [vmem:[%s1098_s11 + $0x78] sm:$0xff]  }
  0x15   : > { %v1010_v19 = vld [vmem:[%s1098_s11 + $0x30] sm:$0xff]   ;;  %v1012_v21 = vld [vmem:[%s1098_s11 + $0x38] sm:$0xff]  }
  0x17   : > { %962 = vmatmul.mubr.msk.f32.gmra.mrb[2].mxu1 %vm565_vm0, %v559_v7  ;;  %918 = vmatpush3.bf16.msra.mxu0 %v1000_v9 }
  0x18   : > { %919 = vmatprep.subr.bf16.mxu0 %v1001_v10  ;;  %972 = vmatprep.mubr.msk.f32.mxu1 %vm679_vm2, %v671_v25 }
  0x1b   : > { %920 = vmatpush3.bf16.msra.mxu0 %v1002_v11 }
  0x1c   : > { %921 = vmatprep.subr.bf16.mxu0 %v1003_v12 }
  0x1f   : > { %922 = vmatpush3.bf16.msra.mxu0 %v1004_v13 }
  0x20   : > { %923 = vmatprep.subr.bf16.mxu0 %v1005_v14 }
  0x23   : > { %924 = vmatpush3.bf16.msra.mxu0 %v1006_v15 }
  0x24   : > { %925 = vmatprep.subr.bf16.mxu0 %v1007_v16 }
  0x27   : > { %926 = vmatpush3.bf16.msra.mxu0 %v1008_v17 }
  0x28   : > { %927 = vmatprep.subr.bf16.mxu0 %v1009_v18 }
  0x2b   : > { %928 = vmatpush3.bf16.msra.mxu0 %v1010_v19 }
  0x2c   : > { %929 = vmatprep.subr.bf16.mxu0 %v1011_v20  ;;  %v676_v20 = vld [vmem:[%s1205_s6 + $0x8] sm:$0xff] }
  0x2f   : > { %930 = vmatpush3.bf16.msra.mxu0 %v1012_v21  ;;  %v675_v21 = vld [vmem:[%s1205_s6] sm:$0xff] }
  0x32   : > { %482 = vmatmul.mubr.bf16.vlgmr.msra.gmra.mrb[0].mxu0 %v1013_v22 }
  0x33   : > { %489 = vmatprep.mubr.bf16.mxu0 %v1016_v23 }
  0x3a   : > { %490 = vmatmul.mubr.bf16.gmra.mrb[4].mxu0 %v1018_v24 }
  0xe6   : > { %v960_v28 = vpop.f32.mrb[0].mxu1 }
  0xe7   : > { %v654_v29 = vadd.f32 %v960_v28, %v562_v26  ;;  %v648_v30 = vpop.f32.mrb[1].mxu1  ;;  %v677_v26 = vld [vmem:[%s1205_s6 + $0x10] sm:$0xff] }
  0xe8   : > { %v649_v31 = vadd.f32 %v648_v30, %v561_v27  ;;  %v678_v30 = vld [vmem:[%s1205_s6 + $0x18] sm:$0xff] }
  0xe9   : > { %v668_v33 = vmax.f32 %v654_v29, 0.0 }
  0xea   : > { %v667_v35 = vmax.f32 %v649_v31, 0.0  ;;  %v963_v36 = vpop.f32.mrb[2].mxu1 }
  0xeb   : > { %v664_v37 = vadd.f32 %v963_v36, %v564_v32  ;;  %v658_v38 = vpop.f32.mrb[3].mxu1 }
  0xec   : > { %v978_v39 = vpack.c.bf16 %v668_v33, %v667_v35  ;;  %v659_v40 = vadd.f32 %v658_v38, %v563_v34 }
  0xed   : > { %v670_v41 = vmax.f32 %v664_v37, 0.0 }
  0xee   : > { %v669_v42 = vmax.f32 %v659_v40, 0.0  ;;  %979 = vmatprep.subr.bf16.mxu1 %v978_v39 }
  0xef   : > { %981 = vmatpush3.bf16.msra.mxu1 %v978_v39 }
  0xf0   : > { %v982_v43 = vpack.c.bf16 %v670_v41, %v669_v42 }
  0xf2   : > { %983 = vmatprep.subr.bf16.mxu1 %v982_v43 }
  0xf3   : > { %985 = vmatpush3.bf16.msra.mxu1 %v982_v43 }
  0xf6   : > { %973 = vmatmul.mubr.msk.f32.vlgmr.msra.gmra.mrb[4].mxu1 %vm679_vm2, %v672_v44 }
  0xf7   : > { %975 = vmatprep.mubr.msk.f32.mxu1 %vm679_vm2, %v673_v45 }
  0xfa   : > { %976 = vmatmul.mubr.msk.f32.gmra.mrb[6].mxu1 %vm679_vm2, %v674_v46 }
 0x105   : > { %v931_v47 = vpop.f32.mrb[0].mxu0 }
 0x106   : > { %v932_v48 = vpop.f32.mrb[1].mxu0 }
 0x107   : > { %v933_v49 = vadd.f32 %v932_v48, %v931_v47  ;;  %v934_v50 = vpop.f32.mrb[2].mxu0 }
 0x108   : > { %v935_v51 = vpop.f32.mrb[3].mxu0 }
 0x109   : > { %v936_v52 = vadd.f32 %v935_v51, %v934_v50  ;;  %v499_v53 = vsel %vm498_vm3, %v933_v49, 0.0 }
 0x10a   : > { %500 = vadd.xlane.f32.xlu0 %v499_v53 }
 0x10b   : > { %v502_v54 = vsel %vm498_vm3, %v936_v52, 0.0 }
 0x10d   : > { %v937_v55 = vpop.f32.mrb[4].mxu0 }
 0x10e   : > { %v938_v56 = vpop.f32.mrb[5].mxu0  ;;  %503 = vadd.xlane.f32.xlu0 %v502_v54 }
 0x10f   : > { %v939_v57 = vadd.f32 %v938_v56, %v937_v55  ;;  %v940_v58 = vpop.f32.mrb[6].mxu0 }
 0x110   : > { %v941_v59 = vpop.f32.mrb[7].mxu0 }
 0x111   : > { %v942_v60 = vadd.f32 %v941_v59, %v940_v58  ;;  %v505_v61 = vsel %vm498_vm3, %v939_v57, 0.0 }
 0x112   : > { %506 = vadd.xlane.f32.xlu1 %v505_v61 }
 0x113   : > { %v508_v62 = vsel %vm498_vm3, %v942_v60, 0.0 }
 0x116   : > { %509 = vadd.xlane.f32.xlu1 %v508_v62 }
 0x197   : > { %v501_v0 = vpop.xlane.xlu0 %500 }
 0x198   : > { %v512_v1 = vmul.f32 0.25, %v501_v0 }
 0x19a   : > { %v516_v2 = vsub.f32 %v933_v49, %v512_v1 }
 0x19b   : > { %v504_v3 = vpop.xlane.xlu0 %503 }
 0x19c   : > { %v513_v4 = vmul.f32 0.25, %v504_v3  ;;  %v520_v5 = vmul.f32 %v516_v2, %v516_v2 }
 0x19e   : > { %v517_v6 = vsub.f32 %v936_v52, %v513_v4  ;;  %v524_v7 = vsel %vm498_vm3, %v520_v5, 0.0 }
 0x19f   : > { %v507_v8 = vpop.xlane.xlu1 %506  ;;  %525 = vadd.xlane.f32.xlu0 %v524_v7 }
 0x1a0   : > { %v514_v9 = vmul.f32 0.25, %v507_v8  ;;  %v521_v10 = vmul.f32 %v517_v6, %v517_v6 }
 0x1a2   : > { %v518_v11 = vsub.f32 %v939_v57, %v514_v9  ;;  %v527_v12 = vsel %vm498_vm3, %v521_v10, 0.0 }
 0x1a3   : > { %v510_v13 = vpop.xlane.xlu1 %509  ;;  %528 = vadd.xlane.f32.xlu1 %v527_v12 }
 0x1a4   : > { %v515_v14 = vmul.f32 0.25, %v510_v13  ;;  %v522_v15 = vmul.f32 %v518_v11, %v518_v11 }
 0x1a6   : > { %v519_v16 = vsub.f32 %v942_v60, %v515_v14  ;;  %v530_v17 = vsel %vm498_vm3, %v522_v15, 0.0 }
 0x1a7   : > { %531 = vadd.xlane.f32.xlu0 %v530_v17 }
 0x1a8   : > { %v523_v18 = vmul.f32 %v519_v16, %v519_v16 }
 0x1aa   : > { %v533_v19 = vsel %vm498_vm3, %v523_v18, 0.0 }
 0x1ab   : > { %534 = vadd.xlane.f32.xlu1 %v533_v19 }
 0x1c9   : > { %v974_v22 = vpop.f32.mrb[4].mxu1 }
 0x1ca   : > { %v764_v23 = vadd.f32 %v974_v22, %v676_v20  ;;  %v758_v24 = vpop.f32.mrb[5].mxu1 }
 0x1cb   : > { %v759_v25 = vadd.f32 %v758_v24, %v675_v21 }
 0x1cc   : > { %784 = vperm.xlu1 %996, %v764_v23  }
 0x1cd   : > { %v977_v27 = vpop.f32.mrb[6].mxu1  ;;  %779 = vperm.xlu0 %995, %v759_v25  }
 0x1ce   : > { %v768_v28 = vpop.f32.mrb[7].mxu1  ;;  %v774_v31 = vadd.f32 %v977_v27, %v678_v30 }
 0x1cf   : > { %v769_v29 = vadd.f32 %v768_v28, %v677_v26 }
 0x1d1   : > { %789 = vperm.xlu1 %996, %v769_v29  }
 0x1d5   : > { %794 = vperm.xlu1 %996, %v774_v31  }
 0x22c   : > { %v526_v32 = vpop.xlane.xlu0 %525 }
 0x22d   : > { %v536_v34 = vmul.f32 0.25, %v526_v32 }
 0x22f   : > { %v540_v38 = vadd.f32 1e-05, %v536_v34 }
 0x230   : > { %v529_v33 = vpop.xlane.xlu1 %528 }
 0x231   : > { %v537_v35 = vmul.f32 0.25, %v529_v33 }
 0x233   : > { %v541_v36 = vadd.f32 1e-05, %v537_v35 }
 0x234   : > { %v532_v37 = vpop.xlane.xlu0 %531 }
 0x235   : > { %v538_v39 = vmul.f32 0.25, %v532_v37  ;;  %1019 = vrsqrt.f32 %v541_v36 }
 0x236   : > { %1021 = vrsqrt.f32 %v540_v38 }
 0x237   : > { %v542_v41 = vadd.f32 1e-05, %v538_v39 }
 0x238   : > { %v535_v40 = vpop.xlane.xlu1 %534 }
 0x239   : > { %v539_v42 = vmul.f32 0.25, %v535_v40  ;;  %1023 = vrsqrt.f32 %v542_v41 }
 0x23b   : > { %v543_v43 = vadd.f32 1e-05, %v539_v42 }
 0x23d   : > { %1025 = vrsqrt.f32 %v543_v43 }
 0x23f   : > { %v1020_v44 = vpop.eup %1019 }
 0x240   : > { %v1022_v45 = vpop.eup %1021  ;;  %v549_v46 = vmul.f32 %v1020_v44, %v517_v6 }
 0x241   : > { %v548_v47 = vmul.f32 %v1022_v45, %v516_v2 }
 0x242   : > { %v553_v49 = vmax.f32 %v549_v46, 0.0 }
 0x243   : > { %v1024_v48 = vpop.eup %1023  ;;  %v552_v51 = vmax.f32 %v548_v47, 0.0 }
 0x244   : > { %v550_v52 = vmul.f32 %v1024_v48, %v518_v11 }
 0x246   : > { %v554_v57 = vmax.f32 %v550_v52, 0.0 }
 0x247   : > { %v1026_v53 = vpop.eup %1025 }
 0x248   : > { %v551_v58 = vmul.f32 %v1026_v53, %v519_v16 }
 0x24a   : > { %v555_v61 = vmax.f32 %v551_v58, 0.0 }
 0x24b   : > { %v785_v50 = vpop.permute.xlu1 %784 }
 0x24c   : > { %v798_v54 = vadd.f32 %v785_v50, %v553_v49  ;;  %v780_v55 = vpop.permute.xlu0 %779 }
 0x24d   : > { %v797_v56 = vadd.f32 %v780_v55, %v552_v51 }
 0x24e   : > { %802 = vst.msk [vmem:[%s295_s12 + $0x8] sm:$0xff] %vm498_vm3, %v798_v54 }
 0x24f   : > { %801 = vst.msk [vmem:[%s295_s12] sm:$0xff] %vm498_vm3, %v797_v56 }
 0x250   : > { %v790_v59 = vpop.permute.xlu1 %789 }
 0x251   : > { %v799_v60 = vadd.f32 %v790_v59, %v554_v57 }
 0x253   : > { %803 = vst.msk [vmem:[%s295_s12 + $0x10] sm:$0xff] %vm498_vm3, %v799_v60 }
 0x254   : > { %v795_v62 = vpop.permute.xlu1 %794 }
 0x255   : > { %v800_v63 = vadd.f32 %v795_v62, %v555_v61 }
 0x257   : > { %804 = vst.msk [vmem:[%s295_s12 + $0x18] sm:$0xff] %vm498_vm3, %v800_v63 }
 0x258 PF: > { %s17_s24 = sadd.s32 1, %s1033_s24  }
 0x259   : > { %p14_p4 = scmp.ge.s32.totalorder %s17_s24, 4  }
 0x25b   :  { %16 = sbr.rel (!%p14_p4) target bundleno = 1 (0x1), region = 81 }

// kernel: generator_forward.12
= control target key start
LH: loop header
LB: loop body
LE: loop exit
PB: predicated region body
PF: predicated region fallthrough
CT: control target
= control target key end

     0   :  { %s767_s12 = smov 0   ;;  %s843_s0 = inlined_call_operand.vmem [shape: bf16[2,288,4], index: 0, kind: input, shape index: {}]   ;;  %s844_s1 = inlined_call_operand.vmem [shape: bf16[32,288], index: 1, kind: input, shape index: {}]   ;;  %s845_s2 = inlined_call_operand.vmem [shape: f32[2,32,4], index: 2, kind: input, shape index: {}]   ;;  %s846_s3 = inlined_call_operand.vmem [shape: f32[2,32,4], index: 3, kind: output, shape index: {}]  }
   0x1 LB: > { %s616_s13 = sadd.s32 4294967295, %s745_s12   ;;  %p620_p0 = scmp.ge.s32.totalorder %s745_s12, 1  ;;  %s745_s12 = sphi %s767_s12, %s13_s12  }
   0x2   : > { %p147_p1 = scmp.lt.s32.totalorder %s745_s12, 3 }
   0x4   : > { %p148_p2 = pnand %p620_p0, %p147_p1 }
   0x5   : > { %p176_p3 = scmp.lt.s32.totalorder (!%p148_p2), %s616_s13, 1  ;;  %vm374_vm0 = vcmask (!%p148_p2), 261120   ;;  %v725_v0 = vld [vmem:[%s844_s1 + $0x4] ss:$12 sps:$4 sm:$0xff] (!%p148_p2)   ;;  %v726_v1 = vld [vmem:[%s844_s1 + $0x8] ss:$12 sps:$4 sm:$0xff] (!%p148_p2)  }
   0x6   : > { %151 = sbr.rel (%p148_p2) target bundleno = 593 (0x251), region = 32  ;;  %413 = vmatprep.mubr.bf16.mxu0 (!%p148_p2), %v725_v0  ;;  %692 = vmatprep.mubr.msk.bf16.mxu1 (!%p148_p2), %vm374_vm0, %v726_v1  ;;  %v727_v17 = vld [vmem:[%s844_s1 + $0x20] ss:$12 sps:$4 sm:$0xff] (!%p148_p2)   ;;  %v728_v22 = vld [vmem:[%s844_s1 + $0x1c] ss:$12 sps:$4 sm:$0xff] (!%p148_p2)   ;;  %vm483_vm1 = vcmask (!%p148_p2), 31744  }
   0x7   : > { %v723_v21 = vld [vmem:[%s844_s1] ss:$12 sps:$4 sm:$0xff] (!%p148_p2)   ;;  %v730_v23 = vld [vmem:[%s844_s1 + $0x18] ss:$12 sps:$4 sm:$0xff] (!%p148_p2)  }
   0xd   : > { %s848_s13 = smov (!%p176_p3, %s616_s13), 1 }
   0xe   : > { %s696_s18 = smul.u32 144, %s848_s13  ;;  %s654_s30 = sshll.u32 %s848_s13, 5 }
   0xf   : > { %s185_s6 = scalar_lea.vmem %s845_s2, %s654_s30  ;;  %s190_s9 = scalar_lea.vmem %s846_s3, %s654_s30 }
  0x10   : > { %s788_s21 = scalar_lea.vmem %s843_s0, %s696_s18 }
  0x11   : > { %v705_v2 = vld [vmem:[%s788_s21 + $0x40] sm:$0xff]   ;;  %v707_v4 = vld [vmem:[%s788_s21 + $0x48] sm:$0xff]   ;;  %v709_v6 = vld [vmem:[%s788_s21 + $0x50] sm:$0xff]  }
  0x12   : > { %v706_v3 = vld [vmem:[%s788_s21] sm:$0xff]   ;;  %656 = vmatprep.subr.bf16.mxu0 %v705_v2  ;;  %v708_v5 = vld [vmem:[%s788_s21 + $0x8] sm:$0xff]   ;;  %v710_v7 = vld [vmem:[%s788_s21 + $0x10] sm:$0xff]  }
  0x13   : > { %657 = vmatpush3.bf16.msra.mxu0 %v706_v3  ;;  %v711_v8 = vld [vmem:[%s788_s21 + $0x58] sm:$0xff]   ;;  %v713_v10 = vld [vmem:[%s788_s21 + $0x60] sm:$0xff]   ;;  %v715_v13 = vld [vmem:[%s788_s21 + $0x68] sm:$0xff]  }
  0x14   : > { %658 = vmatprep.subr.bf16.mxu0 %v707_v4  ;;  %v712_v9 = vld [vmem:[%s788_s21 + $0x18] sm:$0xff]   ;;  %v719_v11 = vld [vmem:[%s788_s21 + $0x80] sm:$0xff]   ;;  %v722_v14 = vld [vmem:[%s788_s21 + $0x88] sm:$0xff]  }
  0x15   : > { %v714_v12 = vld [vmem:[%s788_s21 + $0x20] sm:$0xff]   ;;  %688 = vmatprep.subr.bf16.mxu1 %v719_v11  ;;  %v716_v15 = vld [vmem:[%s788_s21 + $0x28] sm:$0xff]   ;;  %v717_v16 = vld [vmem:[%s788_s21 + $0x70] sm:$0xff]  }
  0x16   : > { %689 = vmatpush3.bf16.msra.mxu1 %v719_v11  ;;  %v718_v18 = vld [vmem:[%s788_s21 + $0x30] sm:$0xff]   ;;  %v720_v19 = vld [vmem:[%s788_s21 + $0x78] sm:$0xff]  }
  0x17   : > { %659 = vmatpush3.bf16.msra.mxu0 %v708_v5  ;;  %690 = vmatprep.subr.bf16.mxu1 %v722_v14  ;;  %v721_v20 = vld [vmem:[%s788_s21 + $0x38] sm:$0xff]  }
  0x18   : > { %660 = vmatprep.subr.bf16.mxu0 %v709_v6 }
  0x1a   : > { %691 = vmatpush3.bf16.msra.mxu1 %v722_v14 }
  0x1b   : > { %661 = vmatpush3.bf16.msra.mxu0 %v710_v7 }
  0x1c   : > { %662 = vmatprep.subr.bf16.mxu0 %v711_v8 }
  0x1d   : > { %693 = vmatmul.mubr.msk.bf16.vlgmr.msra.gmra.mrb[0].mxu1 %vm374_vm0, %v727_v17 }
  0x1f   : > { %663 = vmatpush3.bf16.msra.mxu0 %v712_v9 }
  0x20   : > { %664 = vmatprep.subr.bf16.mxu0 %v713_v10 }
  0x23   : > { %665 = vmatpush3.bf16.msra.mxu0 %v714_v12 }
  0x24   : > { %666 = vmatprep.subr.bf16.mxu0 %v715_v13 }
  0x27   : > { %667 = vmatpush3.bf16.msra.mxu0 %v716_v15 }
  0x28   : > { %668 = vmatprep.subr.bf16.mxu0 %v717_v16 }
  0x2b   : > { %669 = vmatpush3.bf16.msra.mxu0 %v718_v18  ;;  %v479_v18 = vld [vmem:[%s185_s6] sm:$0xff] }
  0x2c   : > { %670 = vmatprep.subr.bf16.mxu0 %v720_v19 }
  0x2f   : > { %671 = vmatpush3.bf16.msra.mxu0 %v721_v20 }
  0x32   : > { %414 = vmatmul.mubr.bf16.vlgmr.msra.gmra.mrb[0].mxu0 %v723_v21 }
  0x33   : > { %421 = vmatprep.mubr.bf16.mxu0 %v728_v22 }
  0x3a   : > { %422 = vmatmul.mubr.bf16.gmra.mrb[4].mxu0 %v730_v23  ;;  %v480_v23 = vld [vmem:[%s185_s6 + $0x8] sm:$0xff] }
  0xf0   : > { %v694_v24 = vpop.f32.mrb[0].mxu1 }
  0xf1   : > { %v464_v25 = vpop.f32.mrb[1].mxu1 }
  0xf2   : > { %v695_v26 = vpop.f32.mrb[2].mxu1 }
  0xf3   : > { %v467_v27 = vpop.f32.mrb[3].mxu1 }
 0x105   : > { %v672_v28 = vpop.f32.mrb[0].mxu0 }
 0x106   : > { %v673_v29 = vpop.f32.mrb[1].mxu0 }
 0x107   : > { %v674_v30 = vadd.f32 %v673_v29, %v672_v28  ;;  %v675_v31 = vpop.f32.mrb[2].mxu0  ;;  %v481_v28 = vld [vmem:[%s185_s6 + $0x10] sm:$0xff] }
 0x108   : > { %v676_v32 = vpop.f32.mrb[3].mxu0 }
 0x109   : > { %v677_v33 = vadd.f32 %v676_v32, %v675_v31  ;;  %v465_v34 = vadd.f32 %v674_v30, %v464_v25 }
 0x10b   : > { %v468_v35 = vadd.f32 %v677_v33, %v467_v27  ;;  %v484_v36 = vsel %vm483_vm1, %v465_v34, 0.0  ;;  %v482_v33 = vld [vmem:[%s185_s6 + $0x18] sm:$0xff] }
 0x10c   : > { %485 = vadd.xlane.f32.xlu0 %v484_v36 }
 0x10d   : > { %v678_v37 = vpop.f32.mrb[4].mxu0  ;;  %v487_v41 = vsel %vm483_vm1, %v468_v35, 0.0 }
 0x10e   : > { %v679_v38 = vpop.f32.mrb[5].mxu0 }
 0x10f   : > { %v680_v39 = vadd.f32 %v679_v38, %v678_v37  ;;  %v681_v40 = vpop.f32.mrb[6].mxu0 }
 0x110   : > { %v682_v42 = vpop.f32.mrb[7].mxu0  ;;  %488 = vadd.xlane.f32.xlu0 %v487_v41 }
 0x111   : > { %v683_v43 = vadd.f32 %v682_v42, %v681_v40  ;;  %v473_v44 = vadd.f32 %v694_v24, %v680_v39 }
 0x113   : > { %v490_v45 = vsel %vm483_vm1, %v473_v44, 0.0  ;;  %v476_v46 = vadd.f32 %v695_v26, %v683_v43 }
 0x114   : > { %491 = vadd.xlane.f32.xlu1 %v490_v45 }
 0x115   : > { %v493_v47 = vsel %vm483_vm1, %v476_v46, 0.0 }
 0x118   : > { %494 = vadd.xlane.f32.xlu1 %v493_v47 }
 0x199   : > { %v486_v48 = vpop.xlane.xlu0 %485 }
 0x19a   : > { %v497_v49 = vmul.f32 0.25, %v486_v48 }
 0x19c   : > { %v501_v50 = vsub.f32 %v465_v34, %v497_v49 }
 0x19d   : > { %v489_v51 = vpop.xlane.xlu0 %488 }
 0x19e   : > { %v498_v52 = vmul.f32 0.25, %v489_v51  ;;  %v505_v53 = vmul.f32 %v501_v50, %v501_v50 }
 0x1a0   : > { %v502_v54 = vsub.f32 %v468_v35, %v498_v52  ;;  %v509_v55 = vsel %vm483_vm1, %v505_v53, 0.0 }
 0x1a1   : > { %v492_v56 = vpop.xlane.xlu1 %491  ;;  %510 = vadd.xlane.f32.xlu0 %v509_v55 }
 0x1a2   : > { %v499_v57 = vmul.f32 0.25, %v492_v56  ;;  %v506_v58 = vmul.f32 %v502_v54, %v502_v54 }
 0x1a4   : > { %v503_v59 = vsub.f32 %v473_v44, %v499_v57  ;;  %v512_v60 = vsel %vm483_vm1, %v506_v58, 0.0 }
 0x1a5   : > { %v495_v61 = vpop.xlane.xlu1 %494  ;;  %513 = vadd.xlane.f32.xlu1 %v512_v60 }
 0x1a6   : > { %v500_v62 = vmul.f32 0.25, %v495_v61  ;;  %v507_v63 = vmul.f32 %v503_v59, %v503_v59 }
 0x1a8   : > { %v504_v0 = vsub.f32 %v476_v46, %v500_v62  ;;  %v515_v1 = vsel %vm483_vm1, %v507_v63, 0.0 }
 0x1a9   : > { %516 = vadd.xlane.f32.xlu0 %v515_v1 }
 0x1aa   : > { %v508_v2 = vmul.f32 %v504_v0, %v504_v0 }
 0x1ac   : > { %v518_v3 = vsel %vm483_vm1, %v508_v2, 0.0 }
 0x1ad   : > { %519 = vadd.xlane.f32.xlu1 %v518_v3 }
 0x22e   : > { %v511_v4 = vpop.xlane.xlu0 %510 }
 0x22f   : > { %v521_v5 = vmul.f32 0.25, %v511_v4 }
 0x231   : > { %v525_v6 = vadd.f32 1e-05, %v521_v5 }
 0x232   : > { %v514_v7 = vpop.xlane.xlu1 %513 }
 0x233   : > { %731 = vrsqrt.f32 %v525_v6  ;;  %v522_v8 = vmul.f32 0.25, %v514_v7 }
 0x235   : > { %v526_v9 = vadd.f32 1e-05, %v522_v8 }
 0x236   : > { %v517_v10 = vpop.xlane.xlu0 %516 }
 0x237   : > { %733 = vrsqrt.f32 %v526_v9  ;;  %v523_v11 = vmul.f32 0.25, %v517_v10 }
 0x239   : > { %v527_v12 = vadd.f32 1e-05, %v523_v11 }
 0x23a   : > { %v520_v13 = vpop.xlane.xlu1 %519 }
 0x23b   : > { %735 = vrsqrt.f32 %v527_v12  ;;  %v524_v14 = vmul.f32 0.25, %v520_v13 }
 0x23d   : > { %v732_v15 = vpop.eup %731  ;;  %v528_v16 = vadd.f32 1e-05, %v524_v14 }
 0x23e   : > { %v533_v17 = vmul.f32 %v732_v15, %v501_v50 }
 0x23f   : > { %737 = vrsqrt.f32 %v528_v16 }
 0x240   : > { %v537_v19 = vmax.f32 %v533_v17, 0.0 }
 0x241   : > { %v734_v20 = vpop.eup %733 }
 0x242   : > { %v541_v21 = vadd.f32 %v537_v19, %v479_v18  ;;  %v534_v22 = vmul.f32 %v734_v20, %v502_v54 }
 0x244   : > { %545 = vst.msk [vmem:[%s190_s9] sm:$0xff] %vm483_vm1, %v541_v21  ;;  %v538_v24 = vmax.f32 %v534_v22, 0.0 }
 0x245   : > { %v736_v25 = vpop.eup %735 }
 0x246   : > { %v542_v26 = vadd.f32 %v538_v24, %v480_v23  ;;  %v535_v27 = vmul.f32 %v736_v25, %v503_v59 }
 0x248   : > { %546 = vst.msk [vmem:[%s190_s9 + $0x8] sm:$0xff] %vm483_vm1, %v542_v26  ;;  %v539_v29 = vmax.f32 %v535_v27, 0.0 }
 0x249   : > { %v738_v30 = vpop.eup %737 }
 0x24a   : > { %v543_v31 = vadd.f32 %v539_v29, %v481_v28  ;;  %v536_v32 = vmul.f32 %v738_v30, %v504_v0 }
 0x24c   : > { %547 = vst.msk [vmem:[%s190_s9 + $0x10] sm:$0xff] %vm483_vm1, %v543_v31  ;;  %v540_v34 = vmax.f32 %v536_v32, 0.0 }
 0x24e   : > { %v544_v35 = vadd.f32 %v540_v34, %v482_v33 }
 0x250   : > { %548 = vst.msk [vmem:[%s190_s9 + $0x18] sm:$0xff] %vm483_vm1, %v544_v35 }
 0x251 PF: > { %s13_s12 = sadd.s32 1, %s745_s12  }
 0x252   : > { %p10_p4 = scmp.ge.s32.totalorder %s13_s12, 4  }
 0x254   :  { %12 = sbr.rel (!%p10_p4) target bundleno = 1 (0x1), region = 65 }

// kernel: generator_forward.15
= control target key start
LH: loop header
LB: loop body
LE: loop exit
PB: predicated region body
PF: predicated region fallthrough
CT: control target
= control target key end

     0   :  { %s609_s9 = smov 0   ;;  %s665_s0 = inlined_call_operand.vmem [shape: bf16[2,288,16], index: 0, kind: input, shape index: {}]   ;;  %s666_s1 = inlined_call_operand.vmem [shape: bf16[16,288], index: 1, kind: input, shape index: {}]   ;;  %s667_s2 = inlined_call_operand.vmem [shape: f32[2,16,16], index: 2, kind: output, shape index: {}]  }
   0x1 LB: > { %s481_s10 = sadd.s32 4294967295, %s590_s9   ;;  %p485_p0 = scmp.ge.s32.totalorder %s590_s9, 1  ;;  %s590_s9 = sphi %s609_s9, %s12_s9  }
   0x2   : > { %p112_p1 = scmp.lt.s32.totalorder %s590_s9, 3 }
   0x4   : > { %p113_p2 = pnand %p485_p0, %p112_p1 }
   0x5   : > { %p134_p3 = scmp.lt.s32.totalorder (!%p113_p2), %s481_s10, 1  ;;  %v592_v0 = vmov (!%p113_p2), 0.0   ;;  %v578_v1 = vld [vmem:[%s666_s1 + $0x4] ss:$12 sps:$4 sm:$0xff] (!%p113_p2)   ;;  %vm593_vm0 = vmmov (!%p113_p2), 0   ;;  %vm308_vm1 = vcmask (!%p113_p2), 261120  }
   0x6   : > { %116 = sbr.rel (%p113_p2) target bundleno = 583 (0x247), region = 28  ;;  %539 = vmatprep.subr.bf16.mxu1 (!%p113_p2), %v592_v0  ;;  %543 = vmatprep.mubr.msk.bf16.mxu1 (!%p113_p2), %vm593_vm0, %v592_v0  ;;  %v579_v16 = vld [vmem:[%s666_s1 + $0x8] ss:$12 sps:$4 sm:$0xff] (!%p113_p2)   ;;  %v576_v21 = vld [vmem:[%s666_s1] ss:$12 sps:$4 sm:$0xff] (!%p113_p2)   ;;  %vm394_vm2 = vcmask (!%p113_p2), 130048  }
   0x7   : > { %344 = vmatprep.mubr.bf16.mxu0 (!%p113_p2), %v578_v1 }
   0xd   : > { %s669_s10 = smov (!%p134_p3, %s481_s10), 1 }
   0xe   : > { %s547_s13 = smul.u32 144, %s669_s10  ;;  %s513_s21 = sshll.u32 %s669_s10, 4 }
   0xf   : > { %s143_s24 = scalar_lea.vmem %s667_s2, %s513_s21 }
  0x10   : > { %s626_s16 = scalar_lea.vmem %s665_s0, %s547_s13 }
  0x11   : > { %v558_v2 = vld [vmem:[%s626_s16 + $0x40] sm:$0xff]   ;;  %v560_v4 = vld [vmem:[%s626_s16 + $0x48] sm:$0xff]   ;;  %v562_v6 = vld [vmem:[%s626_s16 + $0x50] sm:$0xff]  }
  0x12   : > { %v559_v3 = vld [vmem:[%s626_s16] sm:$0xff]   ;;  %514 = vmatprep.subr.bf16.mxu0 %v558_v2  ;;  %v561_v5 = vld [vmem:[%s626_s16 + $0x8] sm:$0xff]   ;;  %v563_v7 = vld [vmem:[%s626_s16 + $0x10] sm:$0xff]  }
  0x13   : > { %515 = vmatpush3.bf16.msra.mxu0 %v559_v3  ;;  %v564_v8 = vld [vmem:[%s626_s16 + $0x58] sm:$0xff]   ;;  %v566_v10 = vld [vmem:[%s626_s16 + $0x60] sm:$0xff]   ;;  %v568_v13 = vld [vmem:[%s626_s16 + $0x68] sm:$0xff]  }
  0x14   : > { %516 = vmatprep.subr.bf16.mxu0 %v560_v4  ;;  %v565_v9 = vld [vmem:[%s626_s16 + $0x18] sm:$0xff]   ;;  %v572_v11 = vld [vmem:[%s626_s16 + $0x80] sm:$0xff]   ;;  %v575_v14 = vld [vmem:[%s626_s16 + $0x88] sm:$0xff]  }
  0x15   : > { %v567_v12 = vld [vmem:[%s626_s16 + $0x20] sm:$0xff]   ;;  %540 = vmatpush3.bf16.msra.mxu1 %v572_v11  ;;  %v569_v15 = vld [vmem:[%s626_s16 + $0x28] sm:$0xff]   ;;  %v570_v17 = vld [vmem:[%s626_s16 + $0x70] sm:$0xff]  }
  0x16   : > { %541 = vmatprep.subr.bf16.mxu1 %v592_v0  ;;  %v571_v18 = vld [vmem:[%s626_s16 + $0x30] sm:$0xff]   ;;  %v573_v19 = vld [vmem:[%s626_s16 + $0x78] sm:$0xff]  }
  0x17   : > { %517 = vmatpush3.bf16.msra.mxu0 %v561_v5  ;;  %v574_v20 = vld [vmem:[%s626_s16 + $0x38] sm:$0xff]  }
  0x18   : > { %518 = vmatprep.subr.bf16.mxu0 %v562_v6 }
  0x19   : > { %542 = vmatpush3.bf16.msra.mxu1 %v575_v14 }
  0x1b   : > { %519 = vmatpush3.bf16.msra.mxu0 %v563_v7 }
  0x1c   : > { %520 = vmatprep.subr.bf16.mxu0 %v564_v8  ;;  %544 = vmatmul.mubr.msk.bf16.vlgmr.msra.gmra.mrb[0].mxu1 %vm308_vm1, %v579_v16 }
  0x1f   : > { %521 = vmatpush3.bf16.msra.mxu0 %v565_v9 }
  0x20   : > { %522 = vmatprep.subr.bf16.mxu0 %v566_v10 }
  0x23   : > { %523 = vmatpush3.bf16.msra.mxu0 %v567_v12 }
  0x24   : > { %524 = vmatprep.subr.bf16.mxu0 %v568_v13 }
  0x27   : > { %525 = vmatpush3.bf16.msra.mxu0 %v569_v15 }
  0x28   : > { %526 = vmatprep.subr.bf16.mxu0 %v570_v17 }
  0x2b   : > { %527 = vmatpush3.bf16.msra.mxu0 %v571_v18 }
  0x2c   : > { %528 = vmatprep.subr.bf16.mxu0 %v573_v19 }
  0x2f   : > { %529 = vmatpush3.bf16.msra.mxu0 %v574_v20 }
  0x32   : > { %345 = vmatmul.mubr.bf16.vlgmr.msra.gmra.mrb[0].mxu0 %v576_v21 }
  0xef   : > { %v387_v22 = vpop.f32.mrb[0].mxu1 }
  0xf0   : > { %v545_v23 = vpop.f32.mrb[1].mxu1 }
  0xf1   : > { %v390_v24 = vpop.f32.mrb[2].mxu1 }
  0xf2   : > { %v546_v25 = vpop.f32.mrb[3].mxu1 }
 0x105   : > { %v530_v26 = vpop.f32.mrb[0].mxu0 }
 0x106   : > { %v531_v27 = vpop.f32.mrb[1].mxu0 }
 0x107   : > { %v532_v28 = vadd.f32 %v531_v27, %v530_v26  ;;  %v533_v29 = vpop.f32.mrb[2].mxu0 }
 0x108   : > { %v534_v30 = vpop.f32.mrb[3].mxu0 }
 0x109   : > { %v535_v31 = vadd.f32 %v534_v30, %v533_v29  ;;  %v388_v32 = vadd.f32 %v532_v28, %v387_v22 }
 0x10b   : > { %v395_v33 = vsel %vm394_vm2, %v388_v32, 0.0  ;;  %v391_v34 = vadd.f32 %v535_v31, %v390_v24 }
 0x10c   : > { %396 = vadd.xlane.f32.xlu0 %v395_v33 }
 0x10d   : > { %v398_v35 = vsel %vm394_vm2, %v391_v34, 0.0 }
 0x110   : > { %399 = vadd.xlane.f32.xlu0 %v398_v35 }
 0x199   : > { %v397_v36 = vpop.xlane.xlu0 %396 }
 0x19a   : > { %v402_v37 = vmul.f32 0.0625, %v397_v36 }
 0x19c   : > { %v404_v38 = vsub.f32 %v388_v32, %v402_v37 }
 0x19d   : > { %v400_v39 = vpop.xlane.xlu0 %399 }
 0x19e   : > { %v403_v40 = vmul.f32 0.0625, %v400_v39  ;;  %v406_v41 = vmul.f32 %v404_v38, %v404_v38 }
 0x1a0   : > { %v405_v42 = vsub.f32 %v391_v34, %v403_v40  ;;  %v408_v43 = vsel %vm394_vm2, %v406_v41, 0.0 }
 0x1a1   : > { %409 = vadd.xlane.f32.xlu1 %v408_v43 }
 0x1a2   : > { %v407_v44 = vmul.f32 %v405_v42, %v405_v42 }
 0x1a4   : > { %v411_v45 = vsel %vm394_vm2, %v407_v44, 0.0 }
 0x1a5   : > { %412 = vadd.xlane.f32.xlu1 %v411_v45 }
 0x22e   : > { %v410_v46 = vpop.xlane.xlu1 %409 }
 0x22f   : > { %v414_v47 = vmul.f32 0.0625, %v410_v46 }
 0x231   : > { %v416_v48 = vadd.f32 1e-05, %v414_v47 }
 0x232   : > { %v413_v49 = vpop.xlane.xlu1 %412 }
 0x233   : > { %580 = vrsqrt.f32 %v416_v48  ;;  %v415_v50 = vmul.f32 0.0625, %v413_v49 }
 0x235   : > { %v417_v51 = vadd.f32 1e-05, %v415_v50 }
 0x237   : > { %582 = vrsqrt.f32 %v417_v51 }
 0x23d   : > { %v581_v52 = vpop.eup %580 }
 0x23e   : > { %v420_v53 = vmul.f32 %v581_v52, %v404_v38 }
 0x240   : > { %v422_v54 = vmax.f32 %v420_v53, 0.0 }
 0x241   : > { %v583_v55 = vpop.eup %582 }
 0x242   : > { %424 = vst.msk [vmem:[%s143_s24] sm:$0xff] %vm394_vm2, %v422_v54  ;;  %v421_v56 = vmul.f32 %v583_v55, %v405_v42 }
 0x244   : > { %v423_v57 = vmax.f32 %v421_v56, 0.0 }
 0x246   : > { %425 = vst.msk [vmem:[%s143_s24 + $0x8] sm:$0xff] %vm394_vm2, %v423_v57 }
 0x247 PF: > { %s12_s9 = sadd.s32 1, %s590_s9  }
 0x248   : > { %p9_p4 = scmp.ge.s32.totalorder %s12_s9, 4  }
 0x24a   :  { %11 = sbr.rel (!%p9_p4) target bundleno = 1 (0x1), region = 58 }

// kernel: generator_forward.16
= control target key start
LH: loop header
LB: loop body
LE: loop exit
PB: predicated region body
PF: predicated region fallthrough
CT: control target
= control target key end

     0   :  { %s404_s9 = smov 0   ;;  %s431_s0 = inlined_call_operand.vmem [shape: bf16[2,144,64], index: 0, kind: input, shape index: {}]   ;;  %s432_s1 = inlined_call_operand.vmem [shape: bf16[8,144], index: 1, kind: input, shape index: {}]   ;;  %s433_s2 = inlined_call_operand.vmem [shape: f32[2,8,64], index: 2, kind: output, shape index: {}]  }
   0x1 LB: > { %s336_s10 = sadd.s32 4294967295, %s386_s9   ;;  %p340_p0 = scmp.ge.s32.totalorder %s386_s9, 1  ;;  %s386_s9 = sphi %s404_s9, %s12_s9  }
   0x2   : > { %p112_p1 = scmp.lt.s32.totalorder %s386_s9, 3 }
   0x4   : > { %p113_p2 = pnand %p340_p0, %p112_p1 }
   0x5   : > { %p133_p3 = scmp.lt.s32.totalorder (!%p113_p2), %s336_s10, 1  ;;  %v143_v0 = vld [vmem:[%s432_s1] sm:$0xff] (!%p113_p2)  ;;  %vm222_vm0 = vcmask (!%p113_p2), 130048   ;;  %v388_v1 = vmov (!%p113_p2), 0   ;;  %vm266_vm1 = vcmask (!%p113_p2), 523264  }
   0x6   : > { %116 = sbr.rel (%p113_p2) target bundleno = 577 (0x241), region = 28  ;;  %226 = vmatprep.subr.bf16.mxu0 (!%p113_p2), %v388_v1  ;;  %v344_v2 = vcombine.high (!%p113_p2), %v143_v0, %v143_v0  ;;  %v343_v12 = vcombine.low (!%p113_p2), %v143_v0, %v143_v0 }
   0x8   : > { %354 = vmatprep.mubr.msk.bf16.mxu0 (!%p113_p2), %vm222_vm0, %v344_v2 }
   0xd   : > { %s435_s10 = smov (!%p133_p3, %s336_s10), 1 }
   0xe   : > { %s357_s13 = smul.u32 72, %s435_s10  ;;  %s342_s17 = sshll.u32 %s435_s10, 3 }
   0xf   : > { %s141_s20 = scalar_lea.vmem %s433_s2, %s342_s17 }
  0x10   : > { %s137_s16 = scalar_lea.vmem %s431_s0, %s357_s13 }
  0x11   : > { %v367_v3 = vld [vmem:[%s137_s16] sm:$0xff]   ;;  %v368_v4 = vld [vmem:[%s137_s16 + $0x8] sm:$0xff]   ;;  %v369_v5 = vld [vmem:[%s137_s16 + $0x10] sm:$0xff]  }
  0x12   : > { %227 = vmatpush1.bf16.msra.mxu0 %v367_v3  ;;  %v370_v6 = vld [vmem:[%s137_s16 + $0x18] sm:$0xff]   ;;  %v371_v7 = vld [vmem:[%s137_s16 + $0x20] sm:$0xff]   ;;  %v372_v8 = vld [vmem:[%s137_s16 + $0x28] sm:$0xff]  }
  0x13   : > { %228 = vmatprep.subr.bf16.mxu0 %v388_v1  ;;  %v373_v9 = vld [vmem:[%s137_s16 + $0x30] sm:$0xff]   ;;  %v374_v10 = vld [vmem:[%s137_s16 + $0x38] sm:$0xff]   ;;  %v375_v11 = vld [vmem:[%s137_s16 + $0x40] sm:$0xff]  }
  0x16   : > { %229 = vmatpush1.bf16.msra.mxu0 %v368_v4 }
  0x17   : > { %230 = vmatprep.subr.bf16.mxu0 %v388_v1 }
  0x1a   : > { %231 = vmatpush1.bf16.msra.mxu0 %v369_v5 }
  0x1b   : > { %232 = vmatprep.subr.bf16.mxu0 %v388_v1 }
  0x1e   : > { %233 = vmatpush1.bf16.msra.mxu0 %v370_v6 }
  0x1f   : > { %234 = vmatprep.subr.bf16.mxu0 %v388_v1 }
  0x22   : > { %235 = vmatpush1.bf16.msra.mxu0 %v371_v7 }
  0x23   : > { %236 = vmatprep.subr.bf16.mxu0 %v388_v1 }
  0x26   : > { %237 = vmatpush1.bf16.msra.mxu0 %v372_v8 }
  0x27   : > { %238 = vmatprep.subr.bf16.mxu0 %v388_v1 }
  0x2a   : > { %239 = vmatpush1.bf16.msra.mxu0 %v373_v9 }
  0x2b   : > { %240 = vmatprep.subr.bf16.mxu0 %v388_v1 }
  0x2e   : > { %241 = vmatpush1.bf16.msra.mxu0 %v374_v10 }
  0x2f   : > { %242 = vmatprep.subr.bf16.mxu0 %v388_v1 }
  0x32   : > { %243 = vmatpush1.bf16.msra.mxu0 %v375_v11 }
  0x35   : > { %259 = vmatmul.mubr.bf16.vlgmr.msra.gmra.mrb[0].mxu0 %v343_v12 }
 0x108   : > { %v260_v13 = vpop.f32.mrb[0].mxu0 }
 0x109   : > { %v262_v14 = vpop.f32.mrb[1].mxu0  ;;  %v267_v15 = vsel %vm266_vm1, %v260_v13, 0.0 }
 0x10a   : > { %268 = vadd.xlane.f32.xlu0 %v267_v15  ;;  %v263_v16 = vpop.f32.mrb[2].mxu0 }
 0x10b   : > { %v264_v17 = vpop.f32.mrb[3].mxu0 }
 0x197   : > { %v269_v18 = vpop.xlane.xlu0 %268 }
 0x198   : > { %v271_v19 = vmul.f32 0.015625, %v269_v18 }
 0x19a   : > { %v272_v20 = vsub.f32 %v260_v13, %v271_v19 }
 0x19c   : > { %v273_v21 = vmul.f32 %v272_v20, %v272_v20 }
 0x19e   : > { %v274_v22 = vsel %vm266_vm1, %v273_v21, 0.0 }
 0x19f   : > { %275 = vadd.xlane.f32.xlu0 %v274_v22 }
 0x22c   : > { %v276_v23 = vpop.xlane.xlu0 %275 }
 0x22d   : > { %v277_v24 = vmul.f32 0.015625, %v276_v23 }
 0x22f   : > { %v278_v25 = vadd.f32 1e-05, %v277_v24 }
 0x231   : > { %378 = vrsqrt.f32 %v278_v25 }
 0x23b   : > { %v379_v26 = vpop.eup %378 }
 0x23c   : > { %v280_v27 = vmul.f32 %v379_v26, %v272_v20 }
 0x23e   : > { %v281_v28 = vmax.f32 %v280_v27, 0.0 }
 0x240   : > { %282 = vst.msk [vmem:[%s141_s20] sm:$0xff] %vm266_vm1, %v281_v28 }
 0x241 PF: > { %s12_s9 = sadd.s32 1, %s386_s9  }
 0x242   : > { %p9_p4 = scmp.ge.s32.totalorder %s12_s9, 4  }
 0x244   :  { %11 = sbr.rel (!%p9_p4) target bundleno = 1 (0x1), region = 58 }

// kernel: generator_forward.17
= control target key start
LH: loop header
LB: loop body
LE: loop exit
PB: predicated region body
PF: predicated region fallthrough
CT: control target
= control target key end

     0   :  { %s428_s12 = smov 0   ;;  %s455_s0 = inlined_call_operand.vmem [shape: bf16[2,72,256], index: 0, kind: input, shape index: {}]   ;;  %s456_s1 = inlined_call_operand.vmem [shape: bf16[3,72], index: 1, kind: input, shape index: {}]   ;;  %s457_s2 = inlined_call_operand.vmem [shape: f32[3,1], index: 2, kind: input, shape index: {}]   ;;  %s458_s3 = inlined_call_operand.vmem [shape: f32[2,3,256], index: 3, kind: output, shape index: {}]  }
   0x1 LB: > { %s347_s13 = sadd.s32 4294967295, %s405_s12   ;;  %p351_p0 = scmp.ge.s32.totalorder %s405_s12, 1  ;;  %s405_s12 = sphi %s428_s12, %s13_s12  }
   0x2   : > { %p137_p1 = scmp.lt.s32.totalorder %s405_s12, 3 }
   0x4   : > { %p138_p2 = pnand %p351_p0, %p137_p1 }
   0x5   : > { %p161_p3 = scmp.lt.s32.totalorder (!%p138_p2), %s347_s13, 1  ;;  %v407_v0 = vmov (!%p138_p2), 0   ;;  %v182_v1 = vld [vmem:[%s457_s2] sm:$0x7] (!%p138_p2)  ;;  %vm237_vm0 = vcmask (!%p138_p2), 1043456   ;;  %vm233_vm1 = vcmask (!%p138_p2), 588800  }
   0x6   : > { %141 = sbr.rel (%p138_p2) target bundleno = 267 (0x10b), region = 32  ;;  %276 = vmatprep.mubr.bf16.mxu0 (!%p138_p2), %v407_v0  ;;  %380 = vset.pattern.permute.xlu0 (!%p138_p2), %v407_v0  ;;  %v172_v14 = vld [vmem:[%s456_s1] sm:$0x3] (!%p138_p2) }
   0x7   : > { %185 = vperm.xlu0 (!%p138_p2), %380, %v182_v1  }
   0xd   : > { %s460_s13 = smov (!%p161_p3, %s347_s13), 1 }
   0xe   : > { %s370_s16 = smul.u32 72, %s460_s13  ;;  %s369_s22 = sshll.u32 %s460_s13, 3 }
   0xf   : > { %s170_s25 = scalar_lea.vmem %s458_s3, %s369_s22 }
  0x10   : > { %s165_s19 = scalar_lea.vmem %s455_s0, %s370_s16 }
  0x11   : > { %v381_v2 = vld [vmem:[%s165_s19 + $0x4] ss:$8 sps:$4 sm:$0xff]   ;;  %v383_v3 = vld [vmem:[%s165_s19] ss:$8 sps:$4 sm:$0xff]   ;;  %v384_v4 = vld [vmem:[%s165_s19 + $0x14] ss:$8 sps:$4 sm:$0xff]  }
  0x12   : > { %244 = vmatprep.subr.bf16.mxu0 %v381_v2  ;;  %v386_v5 = vld [vmem:[%s165_s19 + $0x10] ss:$8 sps:$4 sm:$0xff]   ;;  %v387_v6 = vld [vmem:[%s165_s19 + $0x24] ss:$8 sps:$4 sm:$0xff]   ;;  %v389_v7 = vld [vmem:[%s165_s19 + $0x20] ss:$8 sps:$4 sm:$0xff]  }
  0x13   : > { %245 = vmatpush1.bf16.msra.mxu0 %v383_v3  ;;  %v390_v8 = vld [vmem:[%s165_s19 + $0x34] ss:$8 sps:$4 sm:$0xff]   ;;  %v181_v9 = vld [vmem:[%s165_s19 + $0x40] sm:$0xff]  ;;  %v392_v10 = vld [vmem:[%s165_s19 + $0x30] ss:$8 sps:$4 sm:$0xff]  }
  0x14   : > { %246 = vmatprep.subr.bf16.mxu0 %v384_v4  ;;  %v364_v11 = vcombine.high %v181_v9, %v181_v9  ;;  %v363_v12 = vcombine.low %v181_v9, %v181_v9 }
  0x16   : > { %v239_v13 = vsel %vm237_vm0, %v363_v12, 0 }
  0x17   : > { %247 = vmatpush1.bf16.msra.mxu0 %v386_v5 }
  0x18   : > { %248 = vmatprep.subr.bf16.mxu0 %v387_v6 }
  0x1b   : > { %249 = vmatpush1.bf16.msra.mxu0 %v389_v7 }
  0x1c   : > { %250 = vmatprep.subr.bf16.mxu0 %v390_v8 }
  0x1f   : > { %251 = vmatpush1.bf16.msra.mxu0 %v392_v10 }
  0x20   : > { %365 = vmatprep.subr.msk.bf16.mxu0 %vm237_vm0, %v364_v11 }
  0x23   : > { %253 = vmatpush1.bf16.msra.mxu0 %v239_v13 }
  0x26   : > { %366 = vmatmul.mubr.msk.bf16.vlgmr.msra.gmra.mrb[0].mxu0 %vm233_vm1, %v172_v14 }
  0x86   : > { %v186_v15 = vpop.permute.xlu0 %185 }
  0xf9   : > { %v278_v16 = vpop.f32.mrb[0].mxu0 }
  0xfa   : > { %v279_v17 = vadd.f32 %v278_v16, %v186_v15  ;;  %v280_v18 = vpop.f32.mrb[1].mxu0 }
  0xfb   : > { %v281_v19 = vadd.f32 %v280_v18, %v186_v15  ;;  %v282_v20 = vpop.f32.mrb[2].mxu0 }
  0xfc   : > { %395 = vtanh.f32 %v279_v17  ;;  %v283_v21 = vpop.f32.mrb[3].mxu0 }
  0xfd   : > { %397 = vtanh.f32 %v281_v19 }
 0x106   : > { %v396_v22 = vpop.eup %395 }
 0x107   : > { %v398_v23 = vpop.eup %397 }
 0x108   : > { %v289_v24 = vcombine.low %v396_v22, %v398_v23 }
 0x10a   : > { %291 = vst [vmem:[%s170_s25] sm:$0x77] %v289_v24 }
 0x10b PF: > { %s13_s12 = sadd.s32 1, %s405_s12  }
 0x10c   : > { %p10_p4 = scmp.ge.s32.totalorder %s13_s12, 4  }
 0x10e   :  { %12 = sbr.rel (!%p10_p4) target bundleno = 1 (0x1), region = 62 }

</bundles_post_ra>
